<compile_context>
chip_gen: v7x
topology: tpu7x:2x2x1
jax: 0.10.0
libtpu: 0.0.40
codegen_flags: <defaults>
</compile_context>

<pallas_src>
import functools
import math

import jax
import jax.numpy as jnp
from jax.experimental import pallas as pl
from jax.experimental.pallas import tpu as pltpu

# --- model hyper-parameters (real model: HIDDEN=768, INTER=3072) -------------
HIDDEN = 128          # lane-friendly stand-in for hidden_size=768
INTER = 256           # lane-friendly stand-in for intermediate_size=3072
PAD_C = 128           # discriminator's single logit padded to one full lane width
NEG_SLOPE = 0.01      # nn.LeakyReLU() default negative_slope
B_SRC = 99            # per-domain batch (198 total -> exercises row padding)
B_TGT = 99
TILE_CAP = 256        # max rows per grid step (fills v6e/v7x 256-wide MXU M dim)


def _round_up(x, m):
    return ((x + m - 1) // m) * m


def domain_disc_kernel(hidden_ref,
                       wp_ref, bp_ref, w1_ref, b1_ref, w2_ref, b2_ref,
                       w3_ref, b3_ref,
                       pred_ref, part_ref, *, b_src, b_total):
    """One batch tile: pooler -> Discriminator MLP -> sigmoid + partial BCE sum."""
    i = pl.program_id(0)
    tile_b = hidden_ref.shape[0]

    # ---- pooler + discriminator MLP: bf16 MXU operands, f32 accum/elementwise
    x = hidden_ref[...]                                     # already bf16
    feat = jnp.dot(x, wp_ref[...], preferred_element_type=jnp.float32) + bp_ref[...]

    h = jnp.dot(feat.astype(jnp.bfloat16), w1_ref[...],
                preferred_element_type=jnp.float32) + b1_ref[...]
    h = jnp.where(h > 0.0, h, NEG_SLOPE * h)                # LeakyReLU

    h = jnp.dot(h.astype(jnp.bfloat16), w2_ref[...],
                preferred_element_type=jnp.float32) + b2_ref[...]
    h = jnp.where(h > 0.0, h, NEG_SLOPE * h)                # LeakyReLU

    # Linear(I, 1) -- output lane-padded to 128 (padded columns of w3/b3 are 0)
    z = jnp.dot(h.astype(jnp.bfloat16), w3_ref[...],
                preferred_element_type=jnp.float32) + b3_ref[...]

    # ---- labels + masks built in-kernel: no label tensor is ever DMA'd -------
    lane = jax.lax.broadcasted_iota(jnp.int32, z.shape, 1)
    lane0 = lane == 0                                        # the real (unpadded) logit
    row = jax.lax.broadcasted_iota(jnp.int32, (tile_b, 1), 0) + i * tile_b
    y = (row >= b_src).astype(jnp.float32)                   # 0 = source, 1 = target
    valid = (row < b_total).astype(jnp.float32)              # 0 on padded batch rows

    # pred_feat = Sigmoid(z); lane-dense store, padded lanes/rows zeroed
    p = 1.0 / (1.0 + jnp.exp(-z))
    pred_ref[...] = jnp.where(lane0, p * valid, 0.0)

    # per-tile partial BCE sum, stable form: BCE(sigmoid(z), y) = softplus(z) - y*z
    sp = jnp.maximum(z, 0.0) + jnp.log(1.0 + jnp.exp(-jnp.abs(z)))
    bce = (sp - y * z) * valid
    s_part = jnp.sum(jnp.where(lane0, bce, 0.0))
    part_ref[...] = jnp.broadcast_to(s_part, part_ref.shape)


def network_bak_forward_d(cls_src, cls_tgt, params, *, tile_cap=TILE_CAP):
    """forward_D minus the backbone: returns (pred_feat [B,1] f32, dis_loss scalar)."""
    b_src, h = cls_src.shape
    b_tgt = cls_tgt.shape[0]
    b_tot = b_src + b_tgt
    inter = params[2].shape[1]

    # feat_concat stream is fed to the MXU in bf16 (halves HBM->VMEM input bytes)
    hidden = jnp.concatenate([cls_src, cls_tgt], axis=0).astype(jnp.bfloat16)

    # single grid step for small batches; 256-row tiles for large ones
    tile_b = min(tile_cap, _round_up(b_tot, 8))
    b_pad = _round_up(b_tot, tile_b)
    n_tiles = b_pad // tile_b
    if b_pad != b_tot:
        hidden = jnp.zeros((b_pad, h), jnp.bfloat16).at[:b_tot].set(hidden)

    # weights/biases: constant index maps -> VMEM-resident across all batch tiles
    in_specs = [pl.BlockSpec((tile_b, h), lambda i: (i, 0))]
    in_specs += [pl.BlockSpec(p.shape, lambda i: (0, 0)) for p in params]

    out_shapes = (
        jax.ShapeDtypeStruct((b_pad, PAD_C), jnp.float32),       # sigmoid preds (lane 0)
        jax.ShapeDtypeStruct((n_tiles * 8, PAD_C), jnp.float32),  # per-tile BCE partials
    )
    out_specs = (
        pl.BlockSpec((tile_b, PAD_C), lambda i: (i, 0)),
        pl.BlockSpec((8, PAD_C), lambda i: (i, 0)),
    )

    # explicit VMEM budget: double-buffered params + I/O tiles + activation slack
    param_bytes = sum(int(p.size) * p.dtype.itemsize for p in params)
    io_bytes = tile_b * (h * 2 + PAD_C * 4) + 8 * PAD_C * 4
    act_bytes = 3 * tile_b * inter * 4
    vmem_limit = int(max(2 * (param_bytes + io_bytes) + act_bytes + (8 << 20),
                         16 << 20))

    pred_pad, part = pl.pallas_call(
        functools.partial(domain_disc_kernel, b_src=b_src, b_total=b_tot),
        grid=(n_tiles,),
        in_specs=in_specs,
        out_specs=out_specs,
        out_shape=out_shapes,
        compiler_params=pltpu.CompilerParams(
            # per-tile partial-loss outputs -> no cross-step accumulator -> the
            # batch-tile axis is safe to shard across v7x's 2 TensorCores
            dimension_semantics=("parallel",),
            vmem_limit_bytes=vmem_limit),
    )(hidden, *params)

    pred_feat = pred_pad[:b_tot, :1]
    dis_loss = jnp.sum(part[::8, 0]) / b_tot          # BCELoss reduction='mean'
    return pred_feat, dis_loss


def init_params(key, hidden_size, inter_size):
    """Torch-like Linear init U(-1/sqrt(fan_in), 1/sqrt(fan_in)).

    Weights stored [in, out] (transposed vs torch) in bf16 (MXU operands);
    biases stored [1, out] f32.  The final Linear(inter, 1) is zero-padded to
    PAD_C output lanes so all stores stay lane-dense.
    """
    sizes = [(hidden_size, hidden_size),   # DistilBertEncoder.pooler
             (hidden_size, inter_size),    # Discriminator layer 0
             (inter_size, inter_size),     # Discriminator layer 1
             (inter_size, 1)]              # Discriminator output
    params = []
    for fan_in, fan_out in sizes:
        key, kw, kb = jax.random.split(key, 3)
        bound = 1.0 / math.sqrt(fan_in)
        w = jax.random.uniform(kw, (fan_in, fan_out), jnp.float32, -bound, bound)
        b = jax.random.uniform(kb, (1, fan_out), jnp.float32, -bound, bound)
        if fan_out == 1:                   # pad the single logit to 128 lanes
            w = jnp.zeros((fan_in, PAD_C), jnp.float32).at[:, :1].set(w)
            b = jnp.zeros((1, PAD_C), jnp.float32).at[:, :1].set(b)
        params += [w.astype(jnp.bfloat16), b]
    return tuple(params)


def reference_forward_d(cls_src, cls_tgt, params):
    """Pure-JAX reference of forward_D (same bf16-dot / f32-elementwise split)."""
    wp, bp, w1, b1, w2, b2, w3, b3 = params
    x = jnp.concatenate([cls_src, cls_tgt], axis=0).astype(jnp.bfloat16)
    feat = jnp.dot(x, wp, preferred_element_type=jnp.float32) + bp
    h = jnp.dot(feat.astype(jnp.bfloat16), w1, preferred_element_type=jnp.float32) + b1
    h = jnp.where(h > 0.0, h, NEG_SLOPE * h)
    h = jnp.dot(h.astype(jnp.bfloat16), w2, preferred_element_type=jnp.float32) + b2
    h = jnp.where(h > 0.0, h, NEG_SLOPE * h)
    z = (jnp.dot(h.astype(jnp.bfloat16), w3,
                 preferred_element_type=jnp.float32) + b3)[:, :1]
    pred = 1.0 / (1.0 + jnp.exp(-z))
    y = jnp.concatenate([jnp.zeros((cls_src.shape[0], 1), jnp.float32),
                         jnp.ones((cls_tgt.shape[0], 1), jnp.float32)], axis=0)
    bce = jnp.maximum(z, 0.0) + jnp.log1p(jnp.exp(-jnp.abs(z))) - y * z
    return pred, jnp.mean(bce)


if __name__ == "__main__":
    key = jax.random.PRNGKey(0)
    k_src, k_tgt, k_params = jax.random.split(key, 3)

    # cls_src / cls_tgt stand in for tgt_G(...).hidden_states[-1][:, 0] on the
    # source / target mini-batches (the pretrained backbone is not reproducible
    # in-script).
    cls_src = jax.random.normal(k_src, (B_SRC, HIDDEN), jnp.float32)
    cls_tgt = jax.random.normal(k_tgt, (B_TGT, HIDDEN), jnp.float32)
    params = init_params(k_params, HIDDEN, INTER)

    pred_feat, dis_loss = network_bak_forward_d(cls_src, cls_tgt, params)
    jax.block_until_ready((pred_feat, dis_loss))

    # correctness check vs pure-JAX reference
    ref_pred, ref_loss = reference_forward_d(cls_src, cls_tgt, params)
    assert pred_feat.shape == (B_SRC + B_TGT, 1)
    assert jnp.allclose(pred_feat, ref_pred, atol=2e-3, rtol=2e-3)
    assert jnp.allclose(dis_loss, ref_loss, atol=2e-3, rtol=2e-3)

    print("KERNEL_OK")
</pallas_src>

<mosaic_0001>
module attributes {stable_mosaic.version = 11 : i64} {
  func.func @domain_disc_kernel(%arg0: i32, %arg1: memref<200x128xbf16, #tpu.memory_space<vmem>>, %arg2: memref<128x128xbf16, #tpu.memory_space<vmem>>, %arg3: memref<1x128xf32, #tpu.memory_space<vmem>>, %arg4: memref<128x256xbf16, #tpu.memory_space<vmem>>, %arg5: memref<1x256xf32, #tpu.memory_space<vmem>>, %arg6: memref<256x256xbf16, #tpu.memory_space<vmem>>, %arg7: memref<1x256xf32, #tpu.memory_space<vmem>>, %arg8: memref<256x128xbf16, #tpu.memory_space<vmem>>, %arg9: memref<1x128xf32, #tpu.memory_space<vmem>>, %arg10: memref<200x128xf32, #tpu.memory_space<vmem>>, %arg11: memref<8x128xf32, #tpu.memory_space<vmem>>) attributes {dimension_semantics = [#tpu.dimension_semantics<parallel>], iteration_bounds = array<i64: 1>, scalar_prefetch = 0 : i64, scratch_operands = 0 : i64, tpu.core_type = #tpu.core_type<tc>, window_params = [{transform_indices = @transform_0, window_bounds = array<i64: 200, 128>}, {pipeline_mode = #tpu.pipeline_mode<synchronous>, transform_indices = @transform_1, window_bounds = array<i64: 128, 128>}, {pipeline_mode = #tpu.pipeline_mode<synchronous>, transform_indices = @transform_2, window_bounds = array<i64: 1, 128>}, {pipeline_mode = #tpu.pipeline_mode<synchronous>, transform_indices = @transform_3, window_bounds = array<i64: 128, 256>}, {pipeline_mode = #tpu.pipeline_mode<synchronous>, transform_indices = @transform_4, window_bounds = array<i64: 1, 256>}, {pipeline_mode = #tpu.pipeline_mode<synchronous>, transform_indices = @transform_5, window_bounds = array<i64: 256, 256>}, {pipeline_mode = #tpu.pipeline_mode<synchronous>, transform_indices = @transform_6, window_bounds = array<i64: 1, 256>}, {pipeline_mode = #tpu.pipeline_mode<synchronous>, transform_indices = @transform_7, window_bounds = array<i64: 256, 128>}, {pipeline_mode = #tpu.pipeline_mode<synchronous>, transform_indices = @transform_8, window_bounds = array<i64: 1, 128>}, {transform_indices = @transform_9, window_bounds = array<i64: 200, 128>}, {transform_indices = @transform_10, window_bounds = array<i64: 8, 128>}]} {
    %c0 = arith.constant 0 : index
    %c0_0 = arith.constant 0 : index
    %0 = vector.load %arg1[%c0, %c0_0] : memref<200x128xbf16, #tpu.memory_space<vmem>>, vector<200x128xbf16>
    %c0_1 = arith.constant 0 : index
    %c0_2 = arith.constant 0 : index
    %1 = vector.load %arg2[%c0_1, %c0_2] : memref<128x128xbf16, #tpu.memory_space<vmem>>, vector<128x128xbf16>
    %cst = arith.constant dense<0.000000e+00> : vector<200x128xf32>
    %2 = tpu.matmul %0, %1, %cst {dimension_numbers = #tpu.dot_dimension_numbers<[1], [0], [0], [1], [0, 0, 1, 1], [], []>} : vector<200x128xbf16>, vector<128x128xbf16>, vector<200x128xf32> -> vector<200x128xf32>
    %c0_3 = arith.constant 0 : index
    %c0_4 = arith.constant 0 : index
    %3 = vector.load %arg3[%c0_3, %c0_4] : memref<1x128xf32, #tpu.memory_space<vmem>>, vector<1x128xf32>
    %4 = vector.broadcast %3 : vector<1x128xf32> to vector<200x128xf32>
    %5 = arith.addf %2, %4 : vector<200x128xf32>
    %6 = arith.truncf %5 : vector<200x128xf32> to vector<200x128xbf16>
    %c0_5 = arith.constant 0 : index
    %c0_6 = arith.constant 0 : index
    %7 = vector.load %arg4[%c0_5, %c0_6] : memref<128x256xbf16, #tpu.memory_space<vmem>>, vector<128x256xbf16>
    %cst_7 = arith.constant dense<0.000000e+00> : vector<200x256xf32>
    %8 = tpu.matmul %6, %7, %cst_7 {dimension_numbers = #tpu.dot_dimension_numbers<[1], [0], [0], [1], [0, 0, 1, 1], [], []>} : vector<200x128xbf16>, vector<128x256xbf16>, vector<200x256xf32> -> vector<200x256xf32>
    %c0_8 = arith.constant 0 : index
    %c0_9 = arith.constant 0 : index
    %9 = vector.load %arg5[%c0_8, %c0_9] : memref<1x256xf32, #tpu.memory_space<vmem>>, vector<1x256xf32>
    %10 = vector.broadcast %9 : vector<1x256xf32> to vector<200x256xf32>
    %11 = arith.addf %8, %10 : vector<200x256xf32>
    %cst_10 = arith.constant 0.000000e+00 : f32
    %12 = vector.broadcast %cst_10 : f32 to vector<200x256xf32>
    %13 = arith.cmpf ogt, %11, %12 : vector<200x256xf32>
    %cst_11 = arith.constant 0.00999999977 : f32
    %14 = vector.broadcast %cst_11 : f32 to vector<200x256xf32>
    %15 = arith.mulf %14, %11 : vector<200x256xf32>
    %16 = arith.select %13, %11, %15 : vector<200x256xi1>, vector<200x256xf32>
    %17 = arith.truncf %16 : vector<200x256xf32> to vector<200x256xbf16>
    %c0_12 = arith.constant 0 : index
    %c0_13 = arith.constant 0 : index
    %18 = vector.load %arg6[%c0_12, %c0_13] : memref<256x256xbf16, #tpu.memory_space<vmem>>, vector<256x256xbf16>
    %cst_14 = arith.constant dense<0.000000e+00> : vector<200x256xf32>
    %19 = tpu.matmul %17, %18, %cst_14 {dimension_numbers = #tpu.dot_dimension_numbers<[1], [0], [0], [1], [0, 0, 1, 1], [], []>} : vector<200x256xbf16>, vector<256x256xbf16>, vector<200x256xf32> -> vector<200x256xf32>
    %c0_15 = arith.constant 0 : index
    %c0_16 = arith.constant 0 : index
    %20 = vector.load %arg7[%c0_15, %c0_16] : memref<1x256xf32, #tpu.memory_space<vmem>>, vector<1x256xf32>
    %21 = vector.broadcast %20 : vector<1x256xf32> to vector<200x256xf32>
    %22 = arith.addf %19, %21 : vector<200x256xf32>
    %cst_17 = arith.constant 0.000000e+00 : f32
    %23 = vector.broadcast %cst_17 : f32 to vector<200x256xf32>
    %24 = arith.cmpf ogt, %22, %23 : vector<200x256xf32>
    %cst_18 = arith.constant 0.00999999977 : f32
    %25 = vector.broadcast %cst_18 : f32 to vector<200x256xf32>
    %26 = arith.mulf %25, %22 : vector<200x256xf32>
    %27 = arith.select %24, %22, %26 : vector<200x256xi1>, vector<200x256xf32>
    %28 = arith.truncf %27 : vector<200x256xf32> to vector<200x256xbf16>
    %c0_19 = arith.constant 0 : index
    %c0_20 = arith.constant 0 : index
    %29 = vector.load %arg8[%c0_19, %c0_20] : memref<256x128xbf16, #tpu.memory_space<vmem>>, vector<256x128xbf16>
    %cst_21 = arith.constant dense<0.000000e+00> : vector<200x128xf32>
    %30 = tpu.matmul %28, %29, %cst_21 {dimension_numbers = #tpu.dot_dimension_numbers<[1], [0], [0], [1], [0, 0, 1, 1], [], []>} : vector<200x256xbf16>, vector<256x128xbf16>, vector<200x128xf32> -> vector<200x128xf32>
    %c0_22 = arith.constant 0 : index
    %c0_23 = arith.constant 0 : index
    %31 = vector.load %arg9[%c0_22, %c0_23] : memref<1x128xf32, #tpu.memory_space<vmem>>, vector<1x128xf32>
    %32 = vector.broadcast %31 : vector<1x128xf32> to vector<200x128xf32>
    %33 = arith.addf %30, %32 : vector<200x128xf32>
    %34 = tpu.iota {dimensions = array<i32: 1>} : vector<200x128xi32>
    %c0_i32 = arith.constant 0 : i32
    %35 = vector.broadcast %c0_i32 : i32 to vector<200x128xi32>
    %36 = arith.cmpi eq, %34, %35 : vector<200x128xi32>
    %37 = tpu.iota {dimensions = array<i32: 0>} : vector<200x1xi32>
    %c200_i32 = arith.constant 200 : i32
    %38 = arith.muli %arg0, %c200_i32 : i32
    %39 = vector.broadcast %38 : i32 to vector<200x1xi32>
    %40 = arith.addi %37, %39 : vector<200x1xi32>
    %c99_i32 = arith.constant 99 : i32
    %41 = vector.broadcast %c99_i32 : i32 to vector<200x1xi32>
    %42 = arith.cmpi sge, %40, %41 : vector<200x1xi32>
    %43 = arith.extui %42 : vector<200x1xi1> to vector<200x1xi32>
    %44 = arith.sitofp %43 : vector<200x1xi32> to vector<200x1xf32>
    %c198_i32 = arith.constant 198 : i32
    %45 = vector.broadcast %c198_i32 : i32 to vector<200x1xi32>
    %46 = arith.cmpi slt, %40, %45 : vector<200x1xi32>
    %47 = arith.extui %46 : vector<200x1xi1> to vector<200x1xi32>
    %48 = arith.sitofp %47 : vector<200x1xi32> to vector<200x1xf32>
    %cst_24 = arith.constant 0.000000e+00 : f32
    %49 = vector.broadcast %cst_24 : f32 to vector<200x128xf32>
    %50 = arith.subf %49, %33 : vector<200x128xf32>
    %51 = math.exp %50 : vector<200x128xf32>
    %cst_25 = arith.constant 1.000000e+00 : f32
    %52 = vector.broadcast %cst_25 : f32 to vector<200x128xf32>
    %53 = arith.addf %52, %51 : vector<200x128xf32>
    %cst_26 = arith.constant 1.000000e+00 : f32
    %54 = vector.broadcast %cst_26 : f32 to vector<200x128xf32>
    %55 = arith.divf %54, %53 : vector<200x128xf32>
    %56 = vector.broadcast %48 : vector<200x1xf32> to vector<200x128xf32>
    %57 = arith.mulf %55, %56 : vector<200x128xf32>
    %cst_27 = arith.constant 0.000000e+00 : f32
    %58 = vector.broadcast %cst_27 : f32 to vector<200x128xf32>
    %59 = arith.select %36, %57, %58 : vector<200x128xi1>, vector<200x128xf32>
    %c0_28 = arith.constant 0 : index
    %c0_29 = arith.constant 0 : index
    %60 = vector.load %arg10[%c0_28, %c0_29] : memref<200x128xf32, #tpu.memory_space<vmem>>, vector<200x128xf32>
    tpu.vector_store %arg10[%c0_28, %c0_29], %59 {strides = array<i32>} : memref<200x128xf32, #tpu.memory_space<vmem>>, vector<200x128xf32>,
    %cst_30 = arith.constant 0.000000e+00 : f32
    %61 = vector.broadcast %cst_30 : f32 to vector<200x128xf32>
    %62 = arith.maximumf %33, %61 : vector<200x128xf32>
    %63 = math.absf %33 : vector<200x128xf32>
    %cst_31 = arith.constant 0.000000e+00 : f32
    %64 = vector.broadcast %cst_31 : f32 to vector<200x128xf32>
    %65 = arith.subf %64, %63 : vector<200x128xf32>
    %66 = math.exp %65 : vector<200x128xf32>
    %cst_32 = arith.constant 1.000000e+00 : f32
    %67 = vector.broadcast %cst_32 : f32 to vector<200x128xf32>
    %68 = arith.addf %67, %66 : vector<200x128xf32>
    %69 = math.log %68 : vector<200x128xf32>
    %70 = arith.addf %62, %69 : vector<200x128xf32>
    %71 = vector.broadcast %44 : vector<200x1xf32> to vector<200x128xf32>
    %72 = arith.mulf %71, %33 : vector<200x128xf32>
    %73 = arith.subf %70, %72 : vector<200x128xf32>
    %74 = vector.broadcast %48 : vector<200x1xf32> to vector<200x128xf32>
    %75 = arith.mulf %73, %74 : vector<200x128xf32>
    %cst_33 = arith.constant 0.000000e+00 : f32
    %76 = vector.broadcast %cst_33 : f32 to vector<200x128xf32>
    %77 = arith.select %36, %75, %76 : vector<200x128xi1>, vector<200x128xf32>
    %78 = vector.shape_cast %77 : vector<200x128xf32> to vector<1x200x128xf32>
    %cst_34 = arith.constant dense<0.000000e+00> : vector<1xf32>
    %79 = vector.multi_reduction <add>, %78, %cst_34 [1, 2] : vector<1x200x128xf32> to vector<1xf32>
    %80 = vector.shape_cast %79 : vector<1xf32> to vector<1x1x1xf32>
    %81 = vector.extract %80[0, 0, 0] : f32 from vector<1x1x1xf32>
    %82 = vector.broadcast %81 : f32 to vector<8x128xf32>
    %c0_35 = arith.constant 0 : index
    %c0_36 = arith.constant 0 : index
    %83 = vector.load %arg11[%c0_35, %c0_36] : memref<8x128xf32, #tpu.memory_space<vmem>>, vector<8x128xf32>
    tpu.vector_store %arg11[%c0_35, %c0_36], %82 {strides = array<i32>} : memref<8x128xf32, #tpu.memory_space<vmem>>, vector<8x128xf32>,
    return
  }
  func.func @transform_0(%arg0: i32) -> (i32, i32) {
    %c0_i32 = arith.constant 0 : i32
    %c0_i32_0 = arith.constant 0 : i32
    return %arg0, %c0_i32 : i32, i32
  }
  func.func @transform_1(%arg0: i32) -> (i32, i32) {
    %c0_i32 = arith.constant 0 : i32
    %c0_i32_0 = arith.constant 0 : i32
    %c0_i32_1 = arith.constant 0 : i32
    return %c0_i32, %c0_i32_0 : i32, i32
  }
  func.func @transform_2(%arg0: i32) -> (i32, i32) {
    %c0_i32 = arith.constant 0 : i32
    %c0_i32_0 = arith.constant 0 : i32
    %c0_i32_1 = arith.constant 0 : i32
    return %c0_i32, %c0_i32_0 : i32, i32
  }
  func.func @transform_3(%arg0: i32) -> (i32, i32) {
    %c0_i32 = arith.constant 0 : i32
    %c0_i32_0 = arith.constant 0 : i32
    %c0_i32_1 = arith.constant 0 : i32
    return %c0_i32, %c0_i32_0 : i32, i32
  }
  func.func @transform_4(%arg0: i32) -> (i32, i32) {
    %c0_i32 = arith.constant 0 : i32
    %c0_i32_0 = arith.constant 0 : i32
    %c0_i32_1 = arith.constant 0 : i32
    return %c0_i32, %c0_i32_0 : i32, i32
  }
  func.func @transform_5(%arg0: i32) -> (i32, i32) {
    %c0_i32 = arith.constant 0 : i32
    %c0_i32_0 = arith.constant 0 : i32
    %c0_i32_1 = arith.constant 0 : i32
    return %c0_i32, %c0_i32_0 : i32, i32
  }
  func.func @transform_6(%arg0: i32) -> (i32, i32) {
    %c0_i32 = arith.constant 0 : i32
    %c0_i32_0 = arith.constant 0 : i32
    %c0_i32_1 = arith.constant 0 : i32
    return %c0_i32, %c0_i32_0 : i32, i32
  }
  func.func @transform_7(%arg0: i32) -> (i32, i32) {
    %c0_i32 = arith.constant 0 : i32
    %c0_i32_0 = arith.constant 0 : i32
    %c0_i32_1 = arith.constant 0 : i32
    return %c0_i32, %c0_i32_0 : i32, i32
  }
  func.func @transform_8(%arg0: i32) -> (i32, i32) {
    %c0_i32 = arith.constant 0 : i32
    %c0_i32_0 = arith.constant 0 : i32
    %c0_i32_1 = arith.constant 0 : i32
    return %c0_i32, %c0_i32_0 : i32, i32
  }
  func.func @transform_9(%arg0: i32) -> (i32, i32) {
    %c0_i32 = arith.constant 0 : i32
    %c0_i32_0 = arith.constant 0 : i32
    return %arg0, %c0_i32 : i32, i32
  }
  func.func @transform_10(%arg0: i32) -> (i32, i32) {
    %c0_i32 = arith.constant 0 : i32
    %c0_i32_0 = arith.constant 0 : i32
    return %arg0, %c0_i32 : i32, i32
  }
}

</mosaic_0001>

<bundles_post_ra>
// kernel: tpu_custom_call.1
= control target key start
LH: loop header
LB: loop body
LE: loop exit
PB: predicated region body
PF: predicated region fallthrough
CT: control target
= control target key end

     0   :  { %16 = vsyncpa [#allocation3], 0  ;;  %s4052_s0 = inlined_call_operand.hbm [shape: bf16[200,128], index: 0, kind: input, shape index: {}]   ;;  %s4053_s1 = inlined_call_operand.hbm [shape: bf16[128,128], index: 1, kind: input, shape index: {}]   ;;  %s4054_s2 = inlined_call_operand.vmem [shape: f32[1,128], index: 2, kind: input, shape index: {}]   ;;  %s4055_s3 = inlined_call_operand.hbm [shape: bf16[128,256], index: 3, kind: input, shape index: {}]   ;;  %s4056_s4 = inlined_call_operand.vmem [shape: f32[1,256], index: 4, kind: input, shape index: {}]   ;;  %s4057_s5 = inlined_call_operand.hbm [shape: bf16[256,256], index: 5, kind: input, shape index: {}]   ;;  %s4058_s6 = inlined_call_operand.vmem [shape: f32[1,256], index: 6, kind: input, shape index: {}]   ;;  %s4059_s7 = inlined_call_operand.hbm [shape: bf16[256,128], index: 7, kind: input, shape index: {}]   ;;  %s4060_s8 = inlined_call_operand.vmem [shape: f32[1,128], index: 8, kind: input, shape index: {}]   ;;  %s4061_s9 = inlined_call_operand.hbm [shape: f32[200,128], index: 9, kind: output, shape index: {0}]   ;;  %s4062_s10 = inlined_call_operand.hbm [shape: f32[8,128], index: 10, kind: output, shape index: {1}]  }
   0x1   :  { %17 = vsyncpa [#allocation6], 0 }
   0x2   :  { %18 = vsyncpa [#allocation9], 0 }
   0x3   :  { %19 = vsyncpa [#allocation4], 0 }
   0x4   :  { %20 = vsyncpa [#allocation13], 0  ;;  %s3269_s13 = smov [#allocation5]   ;;  %s3105_s17 = scalar_lea.hbm %s4053_s1, 1024 }
   0x5   :  { %s38_s14 = sshll.u32 %s3269_s13, 4  ;;  %p3106_p0 = scmp.ne.s32.totalorder %s4053_s1, %s3105_s17  ;;  %s39_s14 = int_to_ptr.vmem [resolvable:$true] %s38_s14 }
   0x6   :  { %p3109_p1 = scmp.lt.u32.totalorder %s3105_s17, %s4053_s1 }
   0x8   :  { %p3111_p2 = pnand %p3109_p1, %p3106_p0 }
   0xa   :  { %3114 = shalt.err (!%p3111_p2)
}
   0xb   :  { %s3115_s22 = scalar_lea.vmem %s39_s14, 1024  ;;  %p3120_p4 = scmp.lt.s32.totalorder %s39_s14, %s39_s14 }
   0xc   :  { %p3116_p3 = scmp.ne.s32.totalorder %s39_s14, %s3115_s22  ;;  %p3121_p5 = scmp.lt.s32.totalorder %s3115_s22, %s3115_s22 }
   0xe   :  { %p3122_p6 = por %p3121_p5, %p3120_p4 }
  0x10   :  { %p3123_p7 = pnand %p3122_p6, %p3116_p3 }
  0x12   :  { %3126 = shalt.err (!%p3123_p7)
}
  0x13   :  { %s3270_s23 = smov 64   ;;  %s3271_s24 = smov 4  }
  0x14   :  { %44 = dma.hbm_to_vmem [thread:$0]  %s4053_s1, 1024, %s39_s14, [#allocation6], %s3270_s23, %s3270_s23, %s3271_s24  }
  0x15   :  { %s3272_s27 = smov [#allocation8]   ;;  %s3273_s29 = smov [#allocation2]  }
  0x16   :  { %s66_s28 = sshll.u32 %s3272_s27, 4  ;;  %s26_s30 = sshll.u32 %s3273_s29, 4  ;;  %s67_s28 = int_to_ptr.vmem [resolvable:$true] %s66_s28  ;;  %s27_s30 = int_to_ptr.vmem [resolvable:$true] %s26_s30 }
  0x17   :  { %s3127_s13 = scalar_lea.hbm %s4057_s5, 4096 }
  0x18   :  { %p3128_p8 = scmp.ne.s32.totalorder %s4057_s5, %s3127_s13  ;;  %p3131_p9 = scmp.lt.u32.totalorder %s3127_s13, %s4057_s5 }
  0x1a   :  { %p3133_p10 = pnand %p3131_p9, %p3128_p8 }
  0x1c   :  { %3136 = shalt.err (!%p3133_p10)
}
  0x1d   :  { %s3137_s1 = scalar_lea.vmem %s67_s28, 4096  ;;  %p3142_p12 = scmp.lt.s32.totalorder %s67_s28, %s67_s28 }
  0x1e   :  { %p3138_p11 = scmp.ne.s32.totalorder %s67_s28, %s3137_s1  ;;  %p3143_p13 = scmp.lt.s32.totalorder %s3137_s1, %s3137_s1 }
  0x20   :  { %p3144_p0 = por %p3143_p13, %p3142_p12 }
  0x22   :  { %p3145_p1 = pnand %p3144_p0, %p3138_p11 }
  0x24   :  { %3148 = shalt.err (!%p3145_p1)
}
  0x25   :  { %s3274_s14 = smov 128   ;;  %s3275_s19 = smov 8  }
  0x26   :  { %72 = dma.hbm_to_vmem [thread:$0]  %s4057_s5, 4096, %s67_s28, [#allocation9], %s3274_s14, %s3274_s14, %s3275_s19  }
  0x27   :  { %s3149_s26 = scalar_lea.hbm %s4052_s0, 1600 }
  0x28   :  { %p3150_p2 = scmp.ne.s32.totalorder %s4052_s0, %s3149_s26  ;;  %p3153_p3 = scmp.lt.u32.totalorder %s3149_s26, %s4052_s0 }
  0x2a   :  { %p3155_p4 = pnand %p3153_p3, %p3150_p2 }
  0x2c   :  { %3158 = shalt.err (!%p3155_p4)
}
  0x2d   :  { %s3159_s13 = scalar_lea.vmem %s27_s30, 1600  ;;  %p3164_p6 = scmp.lt.s32.totalorder %s27_s30, %s27_s30 }
  0x2e   :  { %p3160_p5 = scmp.ne.s32.totalorder %s27_s30, %s3159_s13  ;;  %p3165_p7 = scmp.lt.s32.totalorder %s3159_s13, %s3159_s13 }
  0x30   :  { %p3166_p8 = por %p3165_p7, %p3164_p6 }
  0x32   :  { %p3167_p9 = pnand %p3166_p8, %p3160_p5 }
  0x34   :  { %3170 = shalt.err (!%p3167_p9)
}
  0x35   :  { %32 = dma.hbm_to_vmem [thread:$0]  %s4052_s0, 1600, %s27_s30, [#allocation3], %s3270_s23, %s3270_s23, %s3271_s24  }
  0x36   :  { %s3276_s15 = smov [#allocation7]   ;;  %s3277_s17 = smov [#allocation10]  }
  0x37   :  { %s52_s16 = sshll.u32 %s3276_s15, 4  ;;  %s80_s18 = sshll.u32 %s3277_s17, 4  ;;  %s53_s16 = int_to_ptr.vmem [resolvable:$true] %s52_s16  ;;  %s81_s18 = int_to_ptr.vmem [resolvable:$true] %s80_s18 }
  0x38   :  { %s3171_s21 = scalar_lea.hbm %s4055_s3, 2048 }
  0x39   :  { %p3172_p10 = scmp.ne.s32.totalorder %s4055_s3, %s3171_s21  ;;  %p3175_p11 = scmp.lt.u32.totalorder %s3171_s21, %s4055_s3 }
  0x3b   :  { %p3177_p12 = pnand %p3175_p11, %p3172_p10 }
  0x3d   :  { %3180 = shalt.err (!%p3177_p12)
}
  0x3e   :  { %s3181_s0 = scalar_lea.vmem %s53_s16, 2048  ;;  %p3186_p0 = scmp.lt.s32.totalorder %s53_s16, %s53_s16 }
  0x3f   :  { %p3182_p13 = scmp.ne.s32.totalorder %s53_s16, %s3181_s0  ;;  %p3187_p1 = scmp.lt.s32.totalorder %s3181_s0, %s3181_s0 }
  0x41   :  { %p3188_p2 = por %p3187_p1, %p3186_p0 }
  0x43   :  { %p3189_p3 = pnand %p3188_p2, %p3182_p13 }
  0x45   :  { %3192 = shalt.err (!%p3189_p3)
}
  0x46   :  { %58 = dma.hbm_to_vmem [thread:$0]  %s4055_s3, 2048, %s53_s16, [#allocation6], %s3274_s14, %s3274_s14, %s3275_s19  }
  0x47   :  { %s3193_s13 = scalar_lea.hbm %s4059_s7, 2048 }
  0x48   :  { %p3194_p4 = scmp.ne.s32.totalorder %s4059_s7, %s3193_s13  ;;  %p3197_p5 = scmp.lt.u32.totalorder %s3193_s13, %s4059_s7 }
  0x4a   :  { %p3199_p6 = pnand %p3197_p5, %p3194_p4 }
  0x4c   :  { %3202 = shalt.err (!%p3199_p6)
}
  0x4d   :  { %s3203_s1 = scalar_lea.vmem %s81_s18, 2048  ;;  %p3208_p8 = scmp.lt.s32.totalorder %s81_s18, %s81_s18 }
  0x4e   :  { %p3204_p7 = scmp.ne.s32.totalorder %s81_s18, %s3203_s1  ;;  %p3209_p9 = scmp.lt.s32.totalorder %s3203_s1, %s3203_s1 }
  0x50   :  { %p3210_p10 = por %p3209_p9, %p3208_p8 }
  0x52   :  { %p3211_p11 = pnand %p3210_p10, %p3204_p7 }
  0x54   :  { %3214 = shalt.err (!%p3211_p11)
}
  0x55   :  { %86 = dma.hbm_to_vmem [thread:$0]  %s4059_s7, 2048, %s81_s18, [#allocation9], %s3270_s23, %s3270_s23, %s3271_s24  }
  0x56   :  { %3259 = dma.done.wait [#allocation3], 1600  }
  0x57   :  { %3260 = vsyncadd [#allocation3], 4294965696 }
  0x58   :  { %3261 = dma.done.wait [#allocation6], 3072  }
  0x59   :  { %3262 = vsyncadd [#allocation6], 4294964224 }
  0x5a   :  { %3263 = dma.done.wait [#allocation9], 6144  }
  0x5b   :  { %3264 = vsyncadd [#allocation9], 4294961152  ;;  %v3278_v0 = vmov 0.0   ;;  %vm3279_vm0 = vmmov 0   ;;  %v2795_v1 = vld [vmem:[#allocation5] sm:$0xff]   ;;  %v2796_v2 = vld [vmem:[#allocation5 + $0x8] sm:$0xff]  }
  0x5c   :  { %2711 = vmatprep.subr.bf16.mxu0 %v3278_v0  ;;  %2727 = vmatprep.mubr.msk.bf16.mxu0 %vm3279_vm0, %v3278_v0  ;;  %v2797_v3 = vld [vmem:[#allocation5 + $0x10] sm:$0xff]   ;;  %v2798_v4 = vld [vmem:[#allocation5 + $0x18] sm:$0xff]   ;;  %v2799_v5 = vld [vmem:[#allocation5 + $0x20] sm:$0xff]   ;;  %v3280_v37 = vmov 0  }
  0x5d   :  { %2712 = vmatpush3.bf16.msra.mxu0 %v2795_v1  ;;  %v2800_v6 = vld [vmem:[#allocation5 + $0x28] sm:$0xff]   ;;  %v2801_v7 = vld [vmem:[#allocation5 + $0x30] sm:$0xff]   ;;  %v2802_v13 = vld [vmem:[#allocation5 + $0x38] sm:$0xff]   ;;  %566 = vmatprep.mubr.bf16.mxu1 %v3280_v37 }
  0x5e   :  { %2713 = vmatprep.subr.bf16.mxu0 %v3278_v0  ;;  %v2816_v8 = vld [vmem:[#allocation7 + $0x4] ss:$8 sps:$4 sm:$0xff]   ;;  %v2818_v9 = vld [vmem:[#allocation7] ss:$8 sps:$4 sm:$0xff]   ;;  %v2819_v10 = vld [vmem:[#allocation7 + $0x14] ss:$8 sps:$4 sm:$0xff]  }
  0x5f   :  { %534 = vmatprep.subr.bf16.mxu1 %v2816_v8  ;;  %v2821_v11 = vld [vmem:[#allocation7 + $0x10] ss:$8 sps:$4 sm:$0xff]   ;;  %v2822_v12 = vld [vmem:[#allocation7 + $0x24] ss:$8 sps:$4 sm:$0xff]   ;;  %v2824_v14 = vld [vmem:[#allocation7 + $0x20] ss:$8 sps:$4 sm:$0xff]  }
  0x60   :  { %535 = vmatpush1.bf16.msra.mxu1 %v2818_v9  ;;  %v2803_v15 = vld [vmem:[#allocation2] sm:$0xff]   ;;  %v2827_v17 = vld [vmem:[#allocation7 + $0x30] ss:$8 sps:$4 sm:$0xff]   ;;  %v2828_v18 = vld [vmem:[#allocation7 + $0x44] ss:$8 sps:$4 sm:$0xff]  }
  0x61   :  { %2714 = vmatpush3.bf16.msra.mxu0 %v2796_v2  ;;  %536 = vmatprep.subr.bf16.mxu1 %v2819_v10  ;;  %v2825_v16 = vld [vmem:[#allocation7 + $0x34] ss:$8 sps:$4 sm:$0xff]   ;;  %v2830_v19 = vld [vmem:[#allocation7 + $0x40] ss:$8 sps:$4 sm:$0xff]   ;;  %v2833_v22 = vld [vmem:[#allocation7 + $0x50] ss:$8 sps:$4 sm:$0xff]  }
  0x62   :  { %2715 = vmatprep.subr.bf16.mxu0 %v3278_v0  ;;  %v2804_v20 = vld [vmem:[#allocation2 + $0x8] sm:$0xff]   ;;  %v2831_v21 = vld [vmem:[#allocation7 + $0x54] ss:$8 sps:$4 sm:$0xff]   ;;  %v2805_v24 = vld [vmem:[#allocation2 + $0x10] sm:$0xff]  }
  0x63   :  { %v2834_v23 = vld [vmem:[#allocation7 + $0x64] ss:$8 sps:$4 sm:$0xff]   ;;  %v2806_v25 = vld [vmem:[#allocation2 + $0x18] sm:$0xff]   ;;  %v2807_v26 = vld [vmem:[#allocation2 + $0x20] sm:$0xff]  }
  0x64   :  { %537 = vmatpush1.bf16.msra.mxu1 %v2821_v11  ;;  %v2808_v27 = vld [vmem:[#allocation2 + $0x28] sm:$0xff]   ;;  %v2809_v28 = vld [vmem:[#allocation2 + $0x30] sm:$0xff]   ;;  %v2810_v29 = vld [vmem:[#allocation2 + $0x38] sm:$0xff]  }
  0x65   :  { %2716 = vmatpush3.bf16.msra.mxu0 %v2797_v3  ;;  %538 = vmatprep.subr.bf16.mxu1 %v2822_v12  ;;  %v2811_v30 = vld [vmem:[#allocation2 + $0x40] sm:$0xff]   ;;  %v2812_v31 = vld [vmem:[#allocation2 + $0x48] sm:$0xff]   ;;  %v2813_v32 = vld [vmem:[#allocation2 + $0x50] sm:$0xff]  }
  0x66   :  { %2717 = vmatprep.subr.bf16.mxu0 %v3278_v0  ;;  %v2836_v33 = vld [vmem:[#allocation7 + $0x60] ss:$8 sps:$4 sm:$0xff]   ;;  %v2814_v34 = vld [vmem:[#allocation2 + $0x58] sm:$0xff]   ;;  %v2815_v38 = vld [vmem:[#allocation2 + $0x60] ss:$0 sps:$4 sm:$0xff]  }
  0x67   :  { %v2837_v35 = vld [vmem:[#allocation7 + $0x74] ss:$8 sps:$4 sm:$0xff]   ;;  %v2839_v36 = vld [vmem:[#allocation7 + $0x70] ss:$8 sps:$4 sm:$0xff]   ;;  %v2840_v39 = vld [vmem:[#allocation8] ss:$8 sps:$4 sm:$0xff]  }
  0x68   :  { %539 = vmatpush1.bf16.msra.mxu1 %v2824_v14  ;;  %v2842_v40 = vld [vmem:[#allocation8 + $0x4] ss:$8 sps:$4 sm:$0xff]   ;;  %v2845_v41 = vld [vmem:[#allocation8 + $0x14] ss:$8 sps:$4 sm:$0xff]   ;;  %v2843_v42 = vld [vmem:[#allocation8 + $0x10] ss:$8 sps:$4 sm:$0xff]  }
  0x69   :  { %2718 = vmatpush3.bf16.msra.mxu0 %v2798_v4  ;;  %540 = vmatprep.subr.bf16.mxu1 %v2825_v16  ;;  %v2848_v43 = vld [vmem:[#allocation8 + $0x24] ss:$8 sps:$4 sm:$0xff]   ;;  %v2846_v44 = vld [vmem:[#allocation8 + $0x20] ss:$8 sps:$4 sm:$0xff]   ;;  %v2851_v45 = vld [vmem:[#allocation8 + $0x34] ss:$8 sps:$4 sm:$0xff]  }
  0x6a   :  { %2719 = vmatprep.subr.bf16.mxu0 %v3278_v0  ;;  %v2849_v46 = vld [vmem:[#allocation8 + $0x30] ss:$8 sps:$4 sm:$0xff]   ;;  %v2854_v47 = vld [vmem:[#allocation8 + $0x44] ss:$8 sps:$4 sm:$0xff]   ;;  %v2852_v48 = vld [vmem:[#allocation8 + $0x40] ss:$8 sps:$4 sm:$0xff]  }
  0x6b   :  { %v2857_v49 = vld [vmem:[#allocation8 + $0x54] ss:$8 sps:$4 sm:$0xff]   ;;  %v2855_v50 = vld [vmem:[#allocation8 + $0x50] ss:$8 sps:$4 sm:$0xff]   ;;  %v2860_v51 = vld [vmem:[#allocation8 + $0x64] ss:$8 sps:$4 sm:$0xff]  }
  0x6c   :  { %541 = vmatpush1.bf16.msra.mxu1 %v2827_v17  ;;  %v2858_v52 = vld [vmem:[#allocation8 + $0x60] ss:$8 sps:$4 sm:$0xff]   ;;  %v2863_v53 = vld [vmem:[#allocation8 + $0x74] ss:$8 sps:$4 sm:$0xff]   ;;  %v2861_v58 = vld [vmem:[#allocation8 + $0x70] ss:$8 sps:$4 sm:$0xff]  }
  0x6d   :  { %2720 = vmatpush3.bf16.msra.mxu0 %v2799_v5  ;;  %542 = vmatprep.subr.bf16.mxu1 %v2828_v18  ;;  %v3451_v54 = vld [vmem:[%s4054_s2] ss:$0 sm:$0xff]  ;;  %v2866_v62 = vld [vmem:[#allocation8 + $0x84] ss:$8 sps:$4 sm:$0xff]   ;;  %v2864_v1 = vld [vmem:[#allocation8 + $0x80] ss:$8 sps:$4 sm:$0xff]  }
  0x6e   :  { %2721 = vmatprep.subr.bf16.mxu0 %v3278_v0  ;;  %v2869_v2 = vld [vmem:[#allocation8 + $0x94] ss:$8 sps:$4 sm:$0xff]   ;;  %v2872_v10 = vld [vmem:[#allocation8 + $0xa4] ss:$8 sps:$4 sm:$0xff]   ;;  %v2870_v12 = vld [vmem:[#allocation8 + $0xa0] ss:$8 sps:$4 sm:$0xff]  }
  0x6f   :  { %v2873_v17 = vld [vmem:[#allocation8 + $0xb0] ss:$8 sps:$4 sm:$0xff]  }
  0x70   :  { %543 = vmatpush1.bf16.msra.mxu1 %v2830_v19 }
  0x71   :  { %2722 = vmatpush3.bf16.msra.mxu0 %v2800_v6  ;;  %544 = vmatprep.subr.bf16.mxu1 %v2831_v21  ;;  %v2867_v6 = vld [vmem:[#allocation8 + $0x90] ss:$8 sps:$4 sm:$0xff]   ;;  %v2878_v21 = vld [vmem:[#allocation8 + $0xc4] ss:$8 sps:$4 sm:$0xff]  }
  0x72   :  { %2723 = vmatprep.subr.bf16.mxu0 %v3278_v0 }
  0x74   :  { %545 = vmatpush1.bf16.msra.mxu1 %v2833_v22 }
  0x75   :  { %2724 = vmatpush3.bf16.msra.mxu0 %v2801_v7  ;;  %546 = vmatprep.subr.bf16.mxu1 %v2834_v23  ;;  %v2876_v23 = vld [vmem:[#allocation8 + $0xc0] ss:$8 sps:$4 sm:$0xff]  }
  0x76   :  { %2725 = vmatprep.subr.bf16.mxu0 %v3278_v0 }
  0x78   :  { %547 = vmatpush1.bf16.msra.mxu1 %v2836_v33 }
  0x79   :  { %2726 = vmatpush3.bf16.msra.mxu0 %v2802_v13  ;;  %548 = vmatprep.subr.bf16.mxu1 %v2837_v35  ;;  %v2875_v13 = vld [vmem:[#allocation8 + $0xb4] ss:$8 sps:$4 sm:$0xff]  }
  0x7a   :  { %1075 = vmatprep.subr.bf16.mxu0 %v2842_v40 }
  0x7c   :  { %2728 = vmatmul.mubr.bf16.vlgmr.msra.gmra.mrb[0].mxu0 %v2803_v15  ;;  %549 = vmatpush1.bf16.msra.mxu1 %v2839_v36 }
  0x7d   :  { %2731 = vmatprep.mubr.msk.bf16.mxu0 %vm3279_vm0, %v3278_v0  ;;  %1076 = vmatpush1.bf16.msra.mxu0 %v2840_v39 }
  0x7e   :  { %1077 = vmatprep.subr.bf16.mxu0 %v2845_v41 }
  0x81   :  { %1078 = vmatpush1.bf16.msra.mxu0 %v2843_v42 }
  0x82   :  { %1079 = vmatprep.subr.bf16.mxu0 %v2848_v43 }
  0x84   :  { %2732 = vmatmul.mubr.bf16.gmra.mrb[4].mxu0 %v2804_v20 }
  0x85   :  { %2735 = vmatprep.mubr.msk.bf16.mxu0 %vm3279_vm0, %v3278_v0  ;;  %1080 = vmatpush1.bf16.msra.mxu0 %v2846_v44 }
  0x86   :  { %1081 = vmatprep.subr.bf16.mxu0 %v2851_v45 }
  0x89   :  { %1082 = vmatpush1.bf16.msra.mxu0 %v2849_v46 }
  0x8a   :  { %1083 = vmatprep.subr.bf16.mxu0 %v2854_v47 }
  0x8c   :  { %2736 = vmatmul.mubr.bf16.gmra.mrb[8].mxu0 %v2805_v24  ;;  %v2881_v24 = vld [vmem:[#allocation8 + $0xd4] ss:$8 sps:$4 sm:$0xff]  }
  0x8d   :  { %2739 = vmatprep.mubr.msk.bf16.mxu0 %vm3279_vm0, %v3278_v0  ;;  %1084 = vmatpush1.bf16.msra.mxu0 %v2852_v48 }
  0x8e   :  { %1085 = vmatprep.subr.bf16.mxu0 %v2857_v49 }
  0x91   :  { %1086 = vmatpush1.bf16.msra.mxu0 %v2855_v50 }
  0x92   :  { %1087 = vmatprep.subr.bf16.mxu0 %v2860_v51 }
  0x94   :  { %2740 = vmatmul.mubr.bf16.gmra.mrb[12].mxu0 %v2806_v25 }
  0x95   :  { %2743 = vmatprep.mubr.msk.bf16.mxu0 %vm3279_vm0, %v3278_v0  ;;  %1088 = vmatpush1.bf16.msra.mxu0 %v2858_v52 }
  0x96   :  { %1089 = vmatprep.subr.bf16.mxu0 %v2863_v53 }
  0x99   :  { %1090 = vmatpush1.bf16.msra.mxu0 %v2861_v58 }
  0x9a   :  { %1091 = vmatprep.subr.bf16.mxu0 %v2866_v62 }
  0x9c   :  { %2744 = vmatmul.mubr.bf16.gmra.mrb[16].mxu0 %v2807_v26 }
  0x9d   :  { %2747 = vmatprep.mubr.msk.bf16.mxu0 %vm3279_vm0, %v3278_v0  ;;  %1092 = vmatpush1.bf16.msra.mxu0 %v2864_v1 }
  0x9e   :  { %1093 = vmatprep.subr.bf16.mxu0 %v2869_v2 }
  0xa1   :  { %1094 = vmatpush1.bf16.msra.mxu0 %v2867_v6 }
  0xa2   :  { %1095 = vmatprep.subr.bf16.mxu0 %v2872_v10 }
  0xa4   :  { %2748 = vmatmul.mubr.bf16.gmra.mrb[20].mxu0 %v2808_v27 }
  0xa5   :  { %2751 = vmatprep.mubr.msk.bf16.mxu0 %vm3279_vm0, %v3278_v0  ;;  %1096 = vmatpush1.bf16.msra.mxu0 %v2870_v12 }
  0xa6   :  { %1097 = vmatprep.subr.bf16.mxu0 %v2875_v13 }
  0xa9   :  { %1098 = vmatpush1.bf16.msra.mxu0 %v2873_v17 }
  0xaa   :  { %1099 = vmatprep.subr.bf16.mxu0 %v2878_v21 }
  0xac   :  { %2752 = vmatmul.mubr.bf16.gmra.mrb[24].mxu0 %v2809_v28  ;;  %v2879_v28 = vld [vmem:[#allocation8 + $0xd0] ss:$8 sps:$4 sm:$0xff]  }
  0xad   :  { %2755 = vmatprep.mubr.msk.bf16.mxu0 %vm3279_vm0, %v3278_v0  ;;  %1100 = vmatpush1.bf16.msra.mxu0 %v2876_v23 }
  0xae   :  { %1101 = vmatprep.subr.bf16.mxu0 %v2881_v24 }
  0xb1   :  { %1102 = vmatpush1.bf16.msra.mxu0 %v2879_v28 }
  0xb4   :  { %2756 = vmatmul.mubr.bf16.gmra.mrb[28].mxu0 %v2810_v29 }
  0xb5   :  { %2759 = vmatprep.mubr.msk.bf16.mxu0 %vm3279_vm0, %v3278_v0 }
  0xbc   :  { %2760 = vmatmul.mubr.bf16.gmra.mrb[32].mxu0 %v2811_v30 }
  0xbd   :  { %2763 = vmatprep.mubr.msk.bf16.mxu0 %vm3279_vm0, %v3278_v0 }
  0xc4   :  { %2764 = vmatmul.mubr.bf16.gmra.mrb[36].mxu0 %v2812_v31 }
  0xc5   :  { %2767 = vmatprep.mubr.msk.bf16.mxu0 %vm3279_vm0, %v3278_v0 }
  0xcc   :  { %2768 = vmatmul.mubr.bf16.gmra.mrb[40].mxu0 %v2813_v32  ;;  %v2884_v32 = vld [vmem:[#allocation8 + $0xe4] ss:$8 sps:$4 sm:$0xff]  }
  0xcd   :  { %2771 = vmatprep.mubr.msk.bf16.mxu0 %vm3279_vm0, %v3278_v0  ;;  %1103 = vmatprep.subr.bf16.mxu0 %v2884_v32 }
  0xd4   :  { %2772 = vmatmul.mubr.bf16.gmra.mrb[44].mxu0 %v2814_v34  ;;  %v2882_v34 = vld [vmem:[#allocation8 + $0xe0] ss:$8 sps:$4 sm:$0xff]  }
  0xd5   :  { %2775 = vmatprep.mubr.msk.bf16.mxu0 %vm3279_vm0, %v3278_v0  ;;  %1104 = vmatpush1.bf16.msra.mxu0 %v2882_v34  ;;  %v2885_v34 = vld [vmem:[#allocation8 + $0xf0] ss:$8 sps:$4 sm:$0xff]  }
  0xdc   :  { %2776 = vmatmul.mubr.bf16.gmra.mrb[48].mxu0 %v2815_v38 }
 0x14f   :  { %v311_v55 = vpop.f32.mrb[0].mxu0 }
 0x150   :  { %v2729_v56 = vpop.f32.mrb[1].mxu0  ;;  %v312_v59 = vadd.f32 %v3451_v54, %v311_v55 }
 0x151   :  { %v314_v57 = vpop.f32.mrb[2].mxu0 }
 0x152   :  { %v315_v60 = vadd.f32 %v3451_v54, %v314_v57  ;;  %v2730_v61 = vpop.f32.mrb[3].mxu0 }
 0x154   :  { %v413_v63 = vpack.c.bf16 %v315_v60, %v312_v59 }
 0x156   :  { %567 = vmatmul.mubr.bf16.vlgmr.msra.gmra.mrb[0].mxu1 %v413_v63 }
 0x157   :  { %v319_v3 = vpop.f32.mrb[4].mxu0  ;;  %576 = vmatprep.mubr.bf16.mxu1 %v3280_v37 }
 0x158   :  { %v2733_v4 = vpop.f32.mrb[5].mxu0  ;;  %v320_v7 = vadd.f32 %v3451_v54, %v319_v3 }
 0x159   :  { %v322_v5 = vpop.f32.mrb[6].mxu0 }
 0x15a   :  { %v323_v8 = vadd.f32 %v3451_v54, %v322_v5  ;;  %v2734_v9 = vpop.f32.mrb[7].mxu0 }
 0x15c   :  { %v414_v11 = vpack.c.bf16 %v323_v8, %v320_v7 }
 0x15e   :  { %577 = vmatmul.mubr.bf16.gmra.mrb[4].mxu1 %v414_v11 }
 0x15f   :  { %v327_v14 = vpop.f32.mrb[8].mxu0  ;;  %586 = vmatprep.mubr.bf16.mxu1 %v3280_v37 }
 0x160   :  { %v2737_v15 = vpop.f32.mrb[9].mxu0  ;;  %v328_v18 = vadd.f32 %v3451_v54, %v327_v14 }
 0x161   :  { %v330_v16 = vpop.f32.mrb[10].mxu0 }
 0x162   :  { %v331_v19 = vadd.f32 %v3451_v54, %v330_v16  ;;  %v2738_v20 = vpop.f32.mrb[11].mxu0 }
 0x164   :  { %v415_v22 = vpack.c.bf16 %v331_v19, %v328_v18 }
 0x166   :  { %587 = vmatmul.mubr.bf16.gmra.mrb[8].mxu1 %v415_v22 }
 0x167   :  { %v335_v25 = vpop.f32.mrb[12].mxu0  ;;  %596 = vmatprep.mubr.bf16.mxu1 %v3280_v37 }
 0x168   :  { %v2741_v26 = vpop.f32.mrb[13].mxu0  ;;  %v336_v29 = vadd.f32 %v3451_v54, %v335_v25 }
 0x169   :  { %v338_v27 = vpop.f32.mrb[14].mxu0 }
 0x16a   :  { %v339_v30 = vadd.f32 %v3451_v54, %v338_v27  ;;  %v2742_v31 = vpop.f32.mrb[15].mxu0 }
 0x16b   :  { %v2887_v31 = vld [vmem:[#allocation8 + $0xf4] ss:$8 sps:$4 sm:$0xff]  }
 0x16c   :  { %v416_v33 = vpack.c.bf16 %v339_v30, %v336_v29  ;;  %1105 = vmatprep.subr.bf16.mxu0 %v2887_v31 }
 0x16d   :  { %1106 = vmatpush1.bf16.msra.mxu0 %v2885_v34 }
 0x16e   :  { %597 = vmatmul.mubr.bf16.gmra.mrb[12].mxu1 %v416_v33 }
 0x16f   :  { %v343_v35 = vpop.f32.mrb[16].mxu0  ;;  %606 = vmatprep.mubr.bf16.mxu1 %v3280_v37 }
 0x170   :  { %v2745_v36 = vpop.f32.mrb[17].mxu0  ;;  %v344_v39 = vadd.f32 %v3451_v54, %v343_v35 }
 0x171   :  { %v346_v38 = vpop.f32.mrb[18].mxu0 }
 0x172   :  { %v347_v40 = vadd.f32 %v3451_v54, %v346_v38  ;;  %v2746_v41 = vpop.f32.mrb[19].mxu0 }
 0x173   :  { %v2890_v41 = vld [vmem:[#allocation10 + $0x48] sm:$0xff]  }
 0x174   :  { %v417_v42 = vpack.c.bf16 %v347_v40, %v344_v39  ;;  %v2888_v39 = vld [vmem:[#allocation10 + $0x40] sm:$0xff]  }
 0x175   :  { %v2889_v40 = vld [vmem:[#allocation10] sm:$0xff]   ;;  %2617 = vmatprep.subr.bf16.mxu1 %v2888_v39 }
 0x176   :  { %607 = vmatmul.mubr.bf16.gmra.mrb[16].mxu1 %v417_v42  ;;  %v2891_v42 = vld [vmem:[#allocation10 + $0x8] sm:$0xff]  }
 0x177   :  { %v351_v43 = vpop.f32.mrb[20].mxu0  ;;  %616 = vmatprep.mubr.bf16.mxu1 %v3280_v37  ;;  %2618 = vmatpush3.bf16.msra.mxu1 %v2889_v40 }
 0x178   :  { %v2749_v44 = vpop.f32.mrb[21].mxu0  ;;  %v352_v46 = vadd.f32 %v3451_v54, %v351_v43  ;;  %2619 = vmatprep.subr.bf16.mxu1 %v2890_v41  ;;  %v2892_v43 = vld [vmem:[#allocation10 + $0x50] sm:$0xff]  }
 0x179   :  { %v354_v45 = vpop.f32.mrb[22].mxu0  ;;  %v2893_v44 = vld [vmem:[#allocation10 + $0x10] sm:$0xff]  }
 0x17a   :  { %v355_v47 = vadd.f32 %v3451_v54, %v354_v45  ;;  %v2750_v48 = vpop.f32.mrb[23].mxu0 }
 0x17b   :  { %2620 = vmatpush3.bf16.msra.mxu1 %v2891_v42 }
 0x17c   :  { %v418_v49 = vpack.c.bf16 %v355_v47, %v352_v46  ;;  %2621 = vmatprep.subr.bf16.mxu1 %v2892_v43  ;;  %v2895_v46 = vld [vmem:[#allocation10 + $0x18] sm:$0xff]   ;;  %v2896_v47 = vld [vmem:[#allocation10 + $0x60] sm:$0xff]  }
 0x17e   :  { %617 = vmatmul.mubr.bf16.gmra.mrb[20].mxu1 %v418_v49  ;;  %v442_v49 = vld [vmem:[%s4056_s4] sm:$0x3] }
 0x17f   :  { %v359_v50 = vpop.f32.mrb[24].mxu0  ;;  %626 = vmatprep.mubr.bf16.mxu1 %v3280_v37  ;;  %2622 = vmatpush3.bf16.msra.mxu1 %v2893_v44 }
 0x180   :  { %v2753_v51 = vpop.f32.mrb[25].mxu0  ;;  %v360_v53 = vadd.f32 %v3451_v54, %v359_v50 }
 0x181   :  { %v362_v52 = vpop.f32.mrb[26].mxu0  ;;  %v2897_v51 = vld [vmem:[#allocation10 + $0x20] sm:$0xff]  }
 0x182   :  { %v363_v55 = vadd.f32 %v3451_v54, %v362_v52  ;;  %v2754_v56 = vpop.f32.mrb[27].mxu0  ;;  %v2898_v52 = vld [vmem:[#allocation10 + $0x68] sm:$0xff]  }
 0x183   :  { %v2899_v56 = vld [vmem:[#allocation10 + $0x28] sm:$0xff]  }
 0x184   :  { %v419_v57 = vpack.c.bf16 %v363_v55, %v360_v53 }
 0x186   :  { %627 = vmatmul.mubr.bf16.gmra.mrb[24].mxu1 %v419_v57 }
 0x187   :  { %v367_v58 = vpop.f32.mrb[28].mxu0  ;;  %636 = vmatprep.mubr.bf16.mxu1 %v3280_v37 }
 0x188   :  { %v2757_v59 = vpop.f32.mrb[29].mxu0  ;;  %v368_v61 = vadd.f32 %v3451_v54, %v367_v58  ;;  %v2900_v58 = vld [vmem:[#allocation10 + $0x70] sm:$0xff]  }
 0x189   :  { %v370_v60 = vpop.f32.mrb[30].mxu0 }
 0x18a   :  { %v371_v62 = vadd.f32 %v3451_v54, %v370_v60  ;;  %v2758_v63 = vpop.f32.mrb[31].mxu0 }
 0x18c   :  { %v420_v1 = vpack.c.bf16 %v371_v62, %v368_v61 }
 0x18e   :  { %637 = vmatmul.mubr.bf16.gmra.mrb[28].mxu1 %v420_v1 }
 0x18f   :  { %v375_v2 = vpop.f32.mrb[32].mxu0  ;;  %646 = vmatprep.mubr.bf16.mxu1 %v3280_v37 }
 0x190   :  { %v2761_v3 = vpop.f32.mrb[33].mxu0  ;;  %v376_v5 = vadd.f32 %v3451_v54, %v375_v2 }
 0x191   :  { %v378_v4 = vpop.f32.mrb[34].mxu0  ;;  %v2901_v3 = vld [vmem:[#allocation10 + $0x30] sm:$0xff]  }
 0x192   :  { %v379_v6 = vadd.f32 %v3451_v54, %v378_v4  ;;  %v2762_v7 = vpop.f32.mrb[35].mxu0 }
 0x194   :  { %v421_v8 = vpack.c.bf16 %v379_v6, %v376_v5  ;;  %v2902_v6 = vld [vmem:[#allocation10 + $0x78] sm:$0xff]  }
 0x196   :  { %647 = vmatmul.mubr.bf16.gmra.mrb[32].mxu1 %v421_v8 }
 0x197   :  { %v383_v9 = vpop.f32.mrb[36].mxu0  ;;  %656 = vmatprep.mubr.bf16.mxu1 %v3280_v37 }
 0x198   :  { %v2765_v10 = vpop.f32.mrb[37].mxu0  ;;  %v384_v12 = vadd.f32 %v3451_v54, %v383_v9 }
 0x199   :  { %v386_v11 = vpop.f32.mrb[38].mxu0 }
 0x19a   :  { %v387_v13 = vadd.f32 %v3451_v54, %v386_v11  ;;  %v2766_v14 = vpop.f32.mrb[39].mxu0  ;;  %v2903_v11 = vld [vmem:[#allocation10 + $0x38] sm:$0xff]  }
 0x19c   :  { %v422_v15 = vpack.c.bf16 %v387_v13, %v384_v12 }
 0x19e   :  { %657 = vmatmul.mubr.bf16.gmra.mrb[36].mxu1 %v422_v15 }
 0x19f   :  { %v391_v16 = vpop.f32.mrb[40].mxu0  ;;  %666 = vmatprep.mubr.bf16.mxu1 %v3280_v37 }
 0x1a0   :  { %v2769_v17 = vpop.f32.mrb[41].mxu0  ;;  %v392_v19 = vadd.f32 %v3451_v54, %v391_v16 }
 0x1a1   :  { %v394_v18 = vpop.f32.mrb[42].mxu0 }
 0x1a2   :  { %v395_v20 = vadd.f32 %v3451_v54, %v394_v18  ;;  %v2770_v21 = vpop.f32.mrb[43].mxu0 }
 0x1a4   :  { %v423_v22 = vpack.c.bf16 %v395_v20, %v392_v19 }
 0x1a6   :  { %667 = vmatmul.mubr.bf16.gmra.mrb[40].mxu1 %v423_v22 }
 0x1a7   :  { %v399_v23 = vpop.f32.mrb[44].mxu0  ;;  %676 = vmatprep.mubr.bf16.mxu1 %v3280_v37 }
 0x1a8   :  { %v2773_v24 = vpop.f32.mrb[45].mxu0  ;;  %v400_v26 = vadd.f32 %v3451_v54, %v399_v23 }
 0x1a9   :  { %v402_v25 = vpop.f32.mrb[46].mxu0 }
 0x1aa   :  { %v403_v27 = vadd.f32 %v3451_v54, %v402_v25  ;;  %v2774_v28 = vpop.f32.mrb[47].mxu0 }
 0x1ac   :  { %v424_v29 = vpack.c.bf16 %v403_v27, %v400_v26 }
 0x1ae   :  { %677 = vmatmul.mubr.bf16.gmra.mrb[44].mxu1 %v424_v29 }
 0x1af   :  { %v407_v30 = vpop.f32.mrb[48].mxu0  ;;  %686 = vmatprep.mubr.bf16.mxu1 %v3280_v37  ;;  %v444_v37 = vlaneseq }
 0x1b0   :  { %v408_v32 = vadd.f32 %v3451_v54, %v407_v30  ;;  %v2777_v33 = vpop.f32.mrb[49].mxu0  ;;  %v2894_v54 = vld [vmem:[#allocation10 + $0x58] sm:$0xff]  }
 0x1b1   :  { %v410_v35 = vpop.f32.mrb[50].mxu0  ;;  %v3491_v45 = vshrl.u32 %v444_v37, 7  ;;  %2623 = vmatprep.subr.bf16.mxu1 %v2894_v54 }
 0x1b2   :  { %v425_v36 = vpack.c.bf16 %v408_v32, %v408_v32  ;;  %v2778_v38 = vpop.f32.mrb[51].mxu0  ;;  %2624 = vmatpush3.bf16.msra.mxu1 %v2895_v46 }
 0x1b3   :  { %v446_v48 = vsub.s32 0, %v3491_v45  ;;  %v450_v50 = vsub.s32 1, %v3491_v45  ;;  %2625 = vmatprep.subr.bf16.mxu1 %v2896_v47 }
 0x1b5   :  { %v3500_v53 = vrot.slane %v442_v49, %v446_v48  ;;  %v3504_v55 = vrot.slane %v442_v49, %v450_v50 }
 0x1b6   :  { %687 = vmatmul.mubr.bf16.gmra.mrb[48].mxu1 %v425_v36 }
 0x1b7   :  { %2626 = vmatpush3.bf16.msra.mxu1 %v2897_v51 }
 0x1b8   :  { %2627 = vmatprep.subr.bf16.mxu1 %v2898_v52 }
 0x1bb   :  { %2628 = vmatpush3.bf16.msra.mxu1 %v2899_v56 }
 0x1bc   :  { %2629 = vmatprep.subr.bf16.mxu1 %v2900_v58 }
 0x1bf   :  { %2630 = vmatpush3.bf16.msra.mxu1 %v2901_v3 }
 0x1c0   :  { %2631 = vmatprep.subr.bf16.mxu1 %v2902_v6 }
 0x1c3   :  { %2632 = vmatpush3.bf16.msra.mxu1 %v2903_v11 }
 0x229   :  { %v568_v57 = vpop.f32.mrb[0].mxu1 }
 0x22a   :  { %v569_v59 = vadd.f32 %v568_v57, %v3500_v53  ;;  %v570_v60 = vpop.f32.mrb[1].mxu1 }
 0x22b   :  { %v571_v61 = vadd.f32 %v570_v60, %v3504_v55  ;;  %v572_v62 = vpop.f32.mrb[2].mxu1 }
 0x22c   :  { %v745_v63 = vmul.f32 0.01, %v569_v59  ;;  %v573_v1 = vadd.f32 %v572_v62, %v3500_v53  ;;  %v574_v2 = vpop.f32.mrb[3].mxu1  ;;  %vm695_vm1 = vcmp.gt.f32.partialorder %v569_v59, 0.0 }
 0x22d   :  { %v746_v4 = vmul.f32 0.01, %v571_v61  ;;  %v575_v5 = vadd.f32 %v574_v2, %v3504_v55  ;;  %vm696_vm2 = vcmp.gt.f32.partialorder %v571_v61, 0.0 }
 0x22e   :  { %vm697_vm3 = vcmp.gt.f32.partialorder %v573_v1, 0.0  ;;  %v747_v7 = vmul.f32 0.01, %v573_v1  ;;  %v795_v9 = vsel %vm695_vm1, %v569_v59, %v745_v63 }
 0x22f   :  { %vm698_vm4 = vcmp.gt.f32.partialorder %v575_v5, 0.0  ;;  %v748_v8 = vmul.f32 0.01, %v575_v5  ;;  %v796_v14 = vsel %vm696_vm2, %v571_v61, %v746_v4 }
 0x230   :  { %v797_v10 = vsel %vm697_vm3, %v573_v1, %v747_v7 }
 0x231   :  { %v845_v12 = vpack.c.bf16 %v797_v10, %v795_v9  ;;  %v578_v13 = vpop.f32.mrb[4].mxu1  ;;  %v798_v15 = vsel %vm698_vm4, %v575_v5, %v748_v8 }
 0x232   :  { %v579_v16 = vadd.f32 %v578_v13, %v3500_v53  ;;  %v580_v17 = vpop.f32.mrb[5].mxu1  ;;  %v846_v18 = vpack.c.bf16 %v798_v15, %v796_v14 }
 0x233   :  { %v581_v19 = vadd.f32 %v580_v17, %v3504_v55  ;;  %v582_v20 = vpop.f32.mrb[6].mxu1 }
 0x234   :  { %v749_v21 = vmul.f32 0.01, %v579_v16  ;;  %v583_v22 = vadd.f32 %v582_v20, %v3500_v53  ;;  %v584_v23 = vpop.f32.mrb[7].mxu1  ;;  %1107 = vmatprep.mubr.bf16.mxu0 %v846_v18  ;;  %vm699_vm5 = vcmp.gt.f32.partialorder %v579_v16, 0.0 }
 0x235   :  { %v750_v24 = vmul.f32 0.01, %v581_v19  ;;  %v585_v25 = vadd.f32 %v584_v23, %v3504_v55  ;;  %1108 = vmatmul.mubr.bf16.vlgmr.msra.gmra.mrb[52].mxu0 %v845_v12  ;;  %vm700_vm6 = vcmp.gt.f32.partialorder %v581_v19, 0.0 }
 0x236   :  { %vm701_vm7 = vcmp.gt.f32.partialorder %v583_v22, 0.0  ;;  %v751_v26 = vmul.f32 0.01, %v583_v22  ;;  %v799_v28 = vsel %vm699_vm5, %v579_v16, %v749_v21 }
 0x237   :  { %vm702_vm8 = vcmp.gt.f32.partialorder %v585_v25, 0.0  ;;  %v752_v27 = vmul.f32 0.01, %v585_v25  ;;  %v800_v31 = vsel %vm700_vm6, %v581_v19, %v750_v24 }
 0x238   :  { %v801_v29 = vsel %vm701_vm7, %v583_v22, %v751_v26 }
 0x239   :  { %v588_v30 = vpop.f32.mrb[8].mxu1  ;;  %v802_v32 = vsel %vm702_vm8, %v585_v25, %v752_v27  ;;  %v847_v33 = vpack.c.bf16 %v801_v29, %v799_v28 }
 0x23a   :  { %v589_v34 = vadd.f32 %v588_v30, %v3500_v53  ;;  %v590_v35 = vpop.f32.mrb[9].mxu1  ;;  %v848_v36 = vpack.c.bf16 %v802_v32, %v800_v31 }
 0x23b   :  { %v591_v38 = vadd.f32 %v590_v35, %v3504_v55  ;;  %v592_v39 = vpop.f32.mrb[10].mxu1 }
 0x23c   :  { %v753_v40 = vmul.f32 0.01, %v589_v34  ;;  %v593_v41 = vadd.f32 %v592_v39, %v3500_v53  ;;  %v594_v42 = vpop.f32.mrb[11].mxu1  ;;  %1117 = vmatprep.mubr.bf16.mxu0 %v848_v36  ;;  %vm703_vm9 = vcmp.gt.f32.partialorder %v589_v34, 0.0 }
 0x23d   :  { %v754_v43 = vmul.f32 0.01, %v591_v38  ;;  %v595_v44 = vadd.f32 %v594_v42, %v3504_v55  ;;  %1118 = vmatmul.mubr.bf16.gmra.mrb[56].mxu0 %v847_v33  ;;  %vm704_vm10 = vcmp.gt.f32.partialorder %v591_v38, 0.0 }
 0x23e   :  { %vm705_vm11 = vcmp.gt.f32.partialorder %v593_v41, 0.0  ;;  %v755_v54 = vmul.f32 0.01, %v593_v41  ;;  %v803_v47 = vsel %vm703_vm9, %v589_v34, %v753_v40 }
 0x23f   :  { %vm706_vm12 = vcmp.gt.f32.partialorder %v595_v44, 0.0  ;;  %v756_v46 = vmul.f32 0.01, %v595_v44  ;;  %v804_v52 = vsel %vm704_vm10, %v591_v38, %v754_v43 }
 0x240   :  { %v805_v49 = vsel %vm705_vm11, %v593_v41, %v755_v54 }
 0x241   :  { %v598_v51 = vpop.f32.mrb[12].mxu1  ;;  %v806_v56 = vsel %vm706_vm12, %v595_v44, %v756_v46  ;;  %v849_v57 = vpack.c.bf16 %v805_v49, %v803_v47 }
 0x242   :  { %v599_v58 = vadd.f32 %v598_v51, %v3500_v53  ;;  %v600_v59 = vpop.f32.mrb[13].mxu1  ;;  %v850_v60 = vpack.c.bf16 %v806_v56, %v804_v52 }
 0x243   :  { %v601_v61 = vadd.f32 %v600_v59, %v3504_v55  ;;  %v602_v62 = vpop.f32.mrb[14].mxu1 }
 0x244   :  { %v757_v63 = vmul.f32 0.01, %v599_v58  ;;  %v603_v1 = vadd.f32 %v602_v62, %v3500_v53  ;;  %v604_v2 = vpop.f32.mrb[15].mxu1  ;;  %1127 = vmatprep.mubr.bf16.mxu0 %v850_v60  ;;  %vm707_vm13 = vcmp.gt.f32.partialorder %v599_v58, 0.0 }
 0x245   :  { %v758_v3 = vmul.f32 0.01, %v601_v61  ;;  %v605_v4 = vadd.f32 %v604_v2, %v3504_v55  ;;  %1128 = vmatmul.mubr.bf16.gmra.mrb[60].mxu0 %v849_v57  ;;  %vm708_vm14 = vcmp.gt.f32.partialorder %v601_v61, 0.0 }
 0x246   :  { %vm709_vm15 = vcmp.gt.f32.partialorder %v603_v1, 0.0  ;;  %v759_v5 = vmul.f32 0.01, %v603_v1  ;;  %v807_v7 = vsel %vm707_vm13, %v599_v58, %v757_v63 }
 0x247   :  { %vm710_vm0 = vcmp.gt.f32.partialorder %v605_v4, 0.0  ;;  %v760_v6 = vmul.f32 0.01, %v605_v4  ;;  %v808_v10 = vsel %vm708_vm14, %v601_v61, %v758_v3 }
 0x248   :  { %v809_v8 = vsel %vm709_vm15, %v603_v1, %v759_v5 }
 0x249   :  { %v608_v9 = vpop.f32.mrb[16].mxu1  ;;  %v810_v11 = vsel %vm710_vm0, %v605_v4, %v760_v6  ;;  %v851_v12 = vpack.c.bf16 %v809_v8, %v807_v7 }
 0x24a   :  { %v609_v13 = vadd.f32 %v608_v9, %v3500_v53  ;;  %v610_v14 = vpop.f32.mrb[17].mxu1  ;;  %v852_v15 = vpack.c.bf16 %v810_v11, %v808_v10 }
 0x24b   :  { %v611_v16 = vadd.f32 %v610_v14, %v3504_v55  ;;  %v612_v17 = vpop.f32.mrb[18].mxu1 }
 0x24c   :  { %v761_v18 = vmul.f32 0.01, %v609_v13  ;;  %v613_v19 = vadd.f32 %v612_v17, %v3500_v53  ;;  %v614_v20 = vpop.f32.mrb[19].mxu1  ;;  %1137 = vmatprep.mubr.bf16.mxu0 %v852_v15  ;;  %vm711_vm1 = vcmp.gt.f32.partialorder %v609_v13, 0.0 }
 0x24d   :  { %v762_v21 = vmul.f32 0.01, %v611_v16  ;;  %v615_v22 = vadd.f32 %v614_v20, %v3504_v55  ;;  %1138 = vmatmul.mubr.bf16.gmra.mrb[64].mxu0 %v851_v12  ;;  %vm712_vm2 = vcmp.gt.f32.partialorder %v611_v16, 0.0 }
 0x24e   :  { %vm713_vm3 = vcmp.gt.f32.partialorder %v613_v19, 0.0  ;;  %v763_v23 = vmul.f32 0.01, %v613_v19  ;;  %v811_v25 = vsel %vm711_vm1, %v609_v13, %v761_v18 }
 0x24f   :  { %vm714_vm4 = vcmp.gt.f32.partialorder %v615_v22, 0.0  ;;  %v764_v24 = vmul.f32 0.01, %v615_v22  ;;  %v812_v28 = vsel %vm712_vm2, %v611_v16, %v762_v21 }
 0x250   :  { %v813_v26 = vsel %vm713_vm3, %v613_v19, %v763_v23 }
 0x251   :  { %v618_v27 = vpop.f32.mrb[20].mxu1  ;;  %v814_v29 = vsel %vm714_vm4, %v615_v22, %v764_v24  ;;  %v853_v30 = vpack.c.bf16 %v813_v26, %v811_v25 }
 0x252   :  { %v619_v31 = vadd.f32 %v618_v27, %v3500_v53  ;;  %v620_v32 = vpop.f32.mrb[21].mxu1  ;;  %v854_v33 = vpack.c.bf16 %v814_v29, %v812_v28 }
 0x253   :  { %v621_v34 = vadd.f32 %v620_v32, %v3504_v55  ;;  %v622_v35 = vpop.f32.mrb[22].mxu1 }
 0x254   :  { %v765_v36 = vmul.f32 0.01, %v619_v31  ;;  %v623_v38 = vadd.f32 %v622_v35, %v3500_v53  ;;  %v624_v39 = vpop.f32.mrb[23].mxu1  ;;  %1147 = vmatprep.mubr.bf16.mxu0 %v854_v33  ;;  %vm715_vm5 = vcmp.gt.f32.partialorder %v619_v31, 0.0 }
 0x255   :  { %v766_v40 = vmul.f32 0.01, %v621_v34  ;;  %v625_v41 = vadd.f32 %v624_v39, %v3504_v55  ;;  %1148 = vmatmul.mubr.bf16.gmra.mrb[68].mxu0 %v853_v30  ;;  %vm716_vm6 = vcmp.gt.f32.partialorder %v621_v34, 0.0 }
 0x256   :  { %vm717_vm7 = vcmp.gt.f32.partialorder %v623_v38, 0.0  ;;  %v767_v42 = vmul.f32 0.01, %v623_v38  ;;  %v815_v44 = vsel %vm715_vm5, %v619_v31, %v765_v36 }
 0x257   :  { %vm718_vm8 = vcmp.gt.f32.partialorder %v625_v41, 0.0  ;;  %v768_v43 = vmul.f32 0.01, %v625_v41  ;;  %v816_v47 = vsel %vm716_vm6, %v621_v34, %v766_v40 }
 0x258   :  { %v817_v54 = vsel %vm717_vm7, %v623_v38, %v767_v42 }
 0x259   :  { %v628_v46 = vpop.f32.mrb[24].mxu1  ;;  %v818_v49 = vsel %vm718_vm8, %v625_v41, %v768_v43  ;;  %v855_v51 = vpack.c.bf16 %v817_v54, %v815_v44 }
 0x25a   :  { %v629_v52 = vadd.f32 %v628_v46, %v3500_v53  ;;  %v630_v56 = vpop.f32.mrb[25].mxu1  ;;  %v856_v57 = vpack.c.bf16 %v818_v49, %v816_v47 }
 0x25b   :  { %v631_v58 = vadd.f32 %v630_v56, %v3504_v55  ;;  %v632_v59 = vpop.f32.mrb[26].mxu1 }
 0x25c   :  { %v769_v60 = vmul.f32 0.01, %v629_v52  ;;  %v633_v61 = vadd.f32 %v632_v59, %v3500_v53  ;;  %v634_v62 = vpop.f32.mrb[27].mxu1  ;;  %1157 = vmatprep.mubr.bf16.mxu0 %v856_v57  ;;  %vm719_vm9 = vcmp.gt.f32.partialorder %v629_v52, 0.0 }
 0x25d   :  { %v770_v63 = vmul.f32 0.01, %v631_v58  ;;  %v635_v1 = vadd.f32 %v634_v62, %v3504_v55  ;;  %1158 = vmatmul.mubr.bf16.gmra.mrb[72].mxu0 %v855_v51  ;;  %vm720_vm10 = vcmp.gt.f32.partialorder %v631_v58, 0.0 }
 0x25e   :  { %vm721_vm11 = vcmp.gt.f32.partialorder %v633_v61, 0.0  ;;  %v771_v2 = vmul.f32 0.01, %v633_v61  ;;  %v819_v4 = vsel %vm719_vm9, %v629_v52, %v769_v60 }
 0x25f   :  { %vm722_vm12 = vcmp.gt.f32.partialorder %v635_v1, 0.0  ;;  %v772_v3 = vmul.f32 0.01, %v635_v1  ;;  %v820_v7 = vsel %vm720_vm10, %v631_v58, %v770_v63 }
 0x260   :  { %v821_v5 = vsel %vm721_vm11, %v633_v61, %v771_v2 }
 0x261   :  { %v638_v6 = vpop.f32.mrb[28].mxu1  ;;  %v822_v8 = vsel %vm722_vm12, %v635_v1, %v772_v3  ;;  %v857_v9 = vpack.c.bf16 %v821_v5, %v819_v4 }
 0x262   :  { %v639_v10 = vadd.f32 %v638_v6, %v3500_v53  ;;  %v640_v11 = vpop.f32.mrb[29].mxu1  ;;  %v858_v12 = vpack.c.bf16 %v822_v8, %v820_v7 }
 0x263   :  { %v641_v13 = vadd.f32 %v640_v11, %v3504_v55  ;;  %v642_v14 = vpop.f32.mrb[30].mxu1 }
 0x264   :  { %v773_v15 = vmul.f32 0.01, %v639_v10  ;;  %v643_v16 = vadd.f32 %v642_v14, %v3500_v53  ;;  %v644_v17 = vpop.f32.mrb[31].mxu1  ;;  %1167 = vmatprep.mubr.bf16.mxu0 %v858_v12  ;;  %vm723_vm13 = vcmp.gt.f32.partialorder %v639_v10, 0.0 }
 0x265   :  { %v774_v18 = vmul.f32 0.01, %v641_v13  ;;  %v645_v19 = vadd.f32 %v644_v17, %v3504_v55  ;;  %1168 = vmatmul.mubr.bf16.gmra.mrb[76].mxu0 %v857_v9  ;;  %vm724_vm14 = vcmp.gt.f32.partialorder %v641_v13, 0.0 }
 0x266   :  { %vm725_vm15 = vcmp.gt.f32.partialorder %v643_v16, 0.0  ;;  %v775_v20 = vmul.f32 0.01, %v643_v16  ;;  %v823_v22 = vsel %vm723_vm13, %v639_v10, %v773_v15 }
 0x267   :  { %vm726_vm0 = vcmp.gt.f32.partialorder %v645_v19, 0.0  ;;  %v776_v21 = vmul.f32 0.01, %v645_v19  ;;  %v824_v25 = vsel %vm724_vm14, %v641_v13, %v774_v18 }
 0x268   :  { %v825_v23 = vsel %vm725_vm15, %v643_v16, %v775_v20 }
 0x269   :  { %v648_v24 = vpop.f32.mrb[32].mxu1  ;;  %v826_v26 = vsel %vm726_vm0, %v645_v19, %v776_v21  ;;  %v859_v27 = vpack.c.bf16 %v825_v23, %v823_v22 }
 0x26a   :  { %v649_v28 = vadd.f32 %v648_v24, %v3500_v53  ;;  %v650_v29 = vpop.f32.mrb[33].mxu1  ;;  %v860_v30 = vpack.c.bf16 %v826_v26, %v824_v25 }
 0x26b   :  { %v651_v31 = vadd.f32 %v650_v29, %v3504_v55  ;;  %v652_v32 = vpop.f32.mrb[34].mxu1 }
 0x26c   :  { %v777_v33 = vmul.f32 0.01, %v649_v28  ;;  %v653_v34 = vadd.f32 %v652_v32, %v3500_v53  ;;  %v654_v35 = vpop.f32.mrb[35].mxu1  ;;  %1177 = vmatprep.mubr.bf16.mxu0 %v860_v30  ;;  %vm727_vm1 = vcmp.gt.f32.partialorder %v649_v28, 0.0 }
 0x26d   :  { %v778_v36 = vmul.f32 0.01, %v651_v31  ;;  %v655_v38 = vadd.f32 %v654_v35, %v3504_v55  ;;  %1178 = vmatmul.mubr.bf16.gmra.mrb[80].mxu0 %v859_v27  ;;  %vm728_vm2 = vcmp.gt.f32.partialorder %v651_v31, 0.0 }
 0x26e   :  { %vm729_vm3 = vcmp.gt.f32.partialorder %v653_v34, 0.0  ;;  %v779_v39 = vmul.f32 0.01, %v653_v34  ;;  %v827_v41 = vsel %vm727_vm1, %v649_v28, %v777_v33 }
 0x26f   :  { %vm730_vm4 = vcmp.gt.f32.partialorder %v655_v38, 0.0  ;;  %v780_v40 = vmul.f32 0.01, %v655_v38  ;;  %v828_v44 = vsel %vm728_vm2, %v651_v31, %v778_v36 }
 0x270   :  { %v829_v42 = vsel %vm729_vm3, %v653_v34, %v779_v39 }
 0x271   :  { %v658_v43 = vpop.f32.mrb[36].mxu1  ;;  %v830_v54 = vsel %vm730_vm4, %v655_v38, %v780_v40  ;;  %v861_v46 = vpack.c.bf16 %v829_v42, %v827_v41 }
 0x272   :  { %v659_v47 = vadd.f32 %v658_v43, %v3500_v53  ;;  %v660_v49 = vpop.f32.mrb[37].mxu1  ;;  %v862_v51 = vpack.c.bf16 %v830_v54, %v828_v44 }
 0x273   :  { %v661_v52 = vadd.f32 %v660_v49, %v3504_v55  ;;  %v662_v56 = vpop.f32.mrb[38].mxu1 }
 0x274   :  { %v781_v57 = vmul.f32 0.01, %v659_v47  ;;  %v663_v58 = vadd.f32 %v662_v56, %v3500_v53  ;;  %v664_v59 = vpop.f32.mrb[39].mxu1  ;;  %1187 = vmatprep.mubr.bf16.mxu0 %v862_v51  ;;  %vm731_vm5 = vcmp.gt.f32.partialorder %v659_v47, 0.0 }
 0x275   :  { %v782_v60 = vmul.f32 0.01, %v661_v52  ;;  %v665_v61 = vadd.f32 %v664_v59, %v3504_v55  ;;  %1188 = vmatmul.mubr.bf16.gmra.mrb[84].mxu0 %v861_v46  ;;  %vm732_vm6 = vcmp.gt.f32.partialorder %v661_v52, 0.0 }
 0x276   :  { %vm733_vm7 = vcmp.gt.f32.partialorder %v663_v58, 0.0  ;;  %v783_v62 = vmul.f32 0.01, %v663_v58  ;;  %v831_v1 = vsel %vm731_vm5, %v659_v47, %v781_v57 }
 0x277   :  { %vm734_vm8 = vcmp.gt.f32.partialorder %v665_v61, 0.0  ;;  %v784_v63 = vmul.f32 0.01, %v665_v61  ;;  %v832_v4 = vsel %vm732_vm6, %v661_v52, %v782_v60 }
 0x278   :  { %v833_v2 = vsel %vm733_vm7, %v663_v58, %v783_v62 }
 0x279   :  { %v668_v3 = vpop.f32.mrb[40].mxu1  ;;  %v834_v5 = vsel %vm734_vm8, %v665_v61, %v784_v63  ;;  %v863_v6 = vpack.c.bf16 %v833_v2, %v831_v1 }
 0x27a   :  { %v669_v7 = vadd.f32 %v668_v3, %v3500_v53  ;;  %v670_v8 = vpop.f32.mrb[41].mxu1  ;;  %v864_v9 = vpack.c.bf16 %v834_v5, %v832_v4 }
 0x27b   :  { %v671_v10 = vadd.f32 %v670_v8, %v3504_v55  ;;  %v672_v11 = vpop.f32.mrb[42].mxu1 }
 0x27c   :  { %v785_v12 = vmul.f32 0.01, %v669_v7  ;;  %v673_v13 = vadd.f32 %v672_v11, %v3500_v53  ;;  %v674_v14 = vpop.f32.mrb[43].mxu1  ;;  %1197 = vmatprep.mubr.bf16.mxu0 %v864_v9  ;;  %vm735_vm9 = vcmp.gt.f32.partialorder %v669_v7, 0.0 }
 0x27d   :  { %v786_v15 = vmul.f32 0.01, %v671_v10  ;;  %v675_v16 = vadd.f32 %v674_v14, %v3504_v55  ;;  %1198 = vmatmul.mubr.bf16.gmra.mrb[88].mxu0 %v863_v6  ;;  %vm736_vm10 = vcmp.gt.f32.partialorder %v671_v10, 0.0 }
 0x27e   :  { %vm737_vm11 = vcmp.gt.f32.partialorder %v673_v13, 0.0  ;;  %v787_v17 = vmul.f32 0.01, %v673_v13  ;;  %v835_v19 = vsel %vm735_vm9, %v669_v7, %v785_v12 }
 0x27f   :  { %vm738_vm12 = vcmp.gt.f32.partialorder %v675_v16, 0.0  ;;  %v788_v18 = vmul.f32 0.01, %v675_v16  ;;  %v836_v22 = vsel %vm736_vm10, %v671_v10, %v786_v15 }
 0x280   :  { %v837_v20 = vsel %vm737_vm11, %v673_v13, %v787_v17 }
 0x281   :  { %v678_v21 = vpop.f32.mrb[44].mxu1  ;;  %v838_v23 = vsel %vm738_vm12, %v675_v16, %v788_v18  ;;  %v865_v24 = vpack.c.bf16 %v837_v20, %v835_v19 }
 0x282   :  { %v679_v25 = vadd.f32 %v678_v21, %v3500_v53  ;;  %v680_v26 = vpop.f32.mrb[45].mxu1  ;;  %v866_v27 = vpack.c.bf16 %v838_v23, %v836_v22 }
 0x283   :  { %v681_v28 = vadd.f32 %v680_v26, %v3504_v55  ;;  %v682_v29 = vpop.f32.mrb[46].mxu1 }
 0x284   :  { %v789_v30 = vmul.f32 0.01, %v679_v25  ;;  %v683_v31 = vadd.f32 %v682_v29, %v3500_v53  ;;  %v684_v32 = vpop.f32.mrb[47].mxu1  ;;  %1207 = vmatprep.mubr.bf16.mxu0 %v866_v27  ;;  %vm739_vm13 = vcmp.gt.f32.partialorder %v679_v25, 0.0 }
 0x285   :  { %v790_v33 = vmul.f32 0.01, %v681_v28  ;;  %v685_v34 = vadd.f32 %v684_v32, %v3504_v55  ;;  %1208 = vmatmul.mubr.bf16.gmra.mrb[92].mxu0 %v865_v24  ;;  %vm740_vm14 = vcmp.gt.f32.partialorder %v681_v28, 0.0 }
 0x286   :  { %vm741_vm15 = vcmp.gt.f32.partialorder %v683_v31, 0.0  ;;  %v791_v35 = vmul.f32 0.01, %v683_v31  ;;  %v839_v38 = vsel %vm739_vm13, %v679_v25, %v789_v30 }
 0x287   :  { %vm742_vm0 = vcmp.gt.f32.partialorder %v685_v34, 0.0  ;;  %v792_v36 = vmul.f32 0.01, %v685_v34  ;;  %v840_v41 = vsel %vm740_vm14, %v681_v28, %v790_v33 }
 0x288   :  { %v841_v39 = vsel %vm741_vm15, %v683_v31, %v791_v35 }
 0x289   :  { %v688_v40 = vpop.f32.mrb[48].mxu1  ;;  %v842_v42 = vsel %vm742_vm0, %v685_v34, %v792_v36  ;;  %v867_v43 = vpack.c.bf16 %v841_v39, %v839_v38 }
 0x28a   :  { %v689_v44 = vadd.f32 %v688_v40, %v3500_v53  ;;  %v690_v54 = vpop.f32.mrb[49].mxu1  ;;  %v868_v46 = vpack.c.bf16 %v842_v42, %v840_v41  ;;  %v903_v53 = vld [vmem:[%s4058_s6] sm:$0x3] }
 0x28b   :  { %v691_v47 = vadd.f32 %v690_v54, %v3504_v55  ;;  %v692_v49 = vpop.f32.mrb[50].mxu1  ;;  %v3561_v55 = vrot.slane %v903_v53, %v446_v48  ;;  %v3565_v61 = vrot.slane %v903_v53, %v450_v50 }
 0x28c   :  { %v793_v51 = vmul.f32 0.01, %v689_v44  ;;  %1217 = vmatprep.mubr.bf16.mxu0 %v868_v46  ;;  %v693_v52 = vpop.f32.mrb[51].mxu1  ;;  %vm743_vm1 = vcmp.gt.f32.partialorder %v689_v44, 0.0 }
 0x28d   :  { %vm744_vm2 = vcmp.gt.f32.partialorder %v691_v47, 0.0  ;;  %v794_v56 = vmul.f32 0.01, %v691_v47  ;;  %1218 = vmatmul.mubr.bf16.gmra.mrb[96].mxu0 %v867_v43 }
 0x28e   :  { %v843_v59 = vsel %vm743_vm1, %v689_v44, %v793_v51 }
 0x28f   :  { %v844_v57 = vsel %vm744_vm2, %v691_v47, %v794_v56  ;;  %v869_v60 = vpack.c.bf16 %v843_v59, %v843_v59 }
 0x290   :  { %v870_v58 = vpack.c.bf16 %v844_v57, %v844_v57 }
 0x292   :  { %1227 = vmatprep.mubr.bf16.mxu0 %v870_v58 }
 0x295   :  { %1228 = vmatmul.mubr.bf16.gmra.mrb[100].mxu0 %v869_v60 }
 0x308   :  { %v1109_v62 = vpop.f32.mrb[52].mxu0 }
 0x309   :  { %v1110_v63 = vadd.f32 %v1109_v62, %v3561_v55  ;;  %v1111_v1 = vpop.f32.mrb[53].mxu0 }
 0x30a   :  { %v1112_v2 = vadd.f32 %v1111_v1, %v3565_v61  ;;  %v1113_v3 = vpop.f32.mrb[54].mxu0 }
 0x30b   :  { %v1286_v4 = vmul.f32 0.01, %v1110_v63  ;;  %v1114_v5 = vadd.f32 %v1113_v3, %v3561_v55  ;;  %v1115_v6 = vpop.f32.mrb[55].mxu0  ;;  %vm1236_vm3 = vcmp.gt.f32.partialorder %v1110_v63, 0.0 }
 0x30c   :  { %v1287_v7 = vmul.f32 0.01, %v1112_v2  ;;  %v1116_v48 = vadd.f32 %v1115_v6, %v3565_v61  ;;  %vm1237_vm4 = vcmp.gt.f32.partialorder %v1112_v2, 0.0 }
 0x30d   :  { %vm1238_vm5 = vcmp.gt.f32.partialorder %v1114_v5, 0.0  ;;  %v1288_v8 = vmul.f32 0.01, %v1114_v5  ;;  %v1336_v9 = vsel %vm1236_vm3, %v1110_v63, %v1286_v4 }
 0x30e   :  { %vm1239_vm6 = vcmp.gt.f32.partialorder %v1116_v48, 0.0  ;;  %v1289_v50 = vmul.f32 0.01, %v1116_v48  ;;  %v1337_v13 = vsel %vm1237_vm4, %v1112_v2, %v1287_v7 }
 0x30f   :  { %v1338_v10 = vsel %vm1238_vm5, %v1114_v5, %v1288_v8 }
 0x310   :  { %v1386_v11 = vpack.c.bf16 %v1338_v10, %v1336_v9  ;;  %v1119_v12 = vpop.f32.mrb[56].mxu0  ;;  %v1339_v14 = vsel %vm1239_vm6, %v1116_v48, %v1289_v50 }
 0x311   :  { %v1120_v15 = vadd.f32 %v1119_v12, %v3561_v55  ;;  %v1121_v16 = vpop.f32.mrb[57].mxu0  ;;  %v1387_v17 = vpack.c.bf16 %v1339_v14, %v1337_v13 }
 0x312   :  { %v1122_v18 = vadd.f32 %v1121_v16, %v3565_v61  ;;  %v1123_v19 = vpop.f32.mrb[58].mxu0 }
 0x313   :  { %v1290_v20 = vmul.f32 0.01, %v1120_v15  ;;  %v1124_v21 = vadd.f32 %v1123_v19, %v3561_v55  ;;  %v1125_v22 = vpop.f32.mrb[59].mxu0  ;;  %1579 = vmatprep.mubr.bf16.mxu1 %v1387_v17  ;;  %vm1240_vm7 = vcmp.gt.f32.partialorder %v1120_v15, 0.0 }
 0x314   :  { %v1291_v23 = vmul.f32 0.01, %v1122_v18  ;;  %v1126_v24 = vadd.f32 %v1125_v22, %v3565_v61  ;;  %1580 = vmatmul.mubr.bf16.vlgmr.msra.gmra.mrb[52].mxu1 %v1386_v11  ;;  %vm1241_vm8 = vcmp.gt.f32.partialorder %v1122_v18, 0.0 }
 0x315   :  { %vm1242_vm9 = vcmp.gt.f32.partialorder %v1124_v21, 0.0  ;;  %v1292_v25 = vmul.f32 0.01, %v1124_v21  ;;  %v1340_v27 = vsel %vm1240_vm7, %v1120_v15, %v1290_v20 }
 0x316   :  { %vm1243_vm10 = vcmp.gt.f32.partialorder %v1126_v24, 0.0  ;;  %v1293_v26 = vmul.f32 0.01, %v1126_v24  ;;  %v1341_v30 = vsel %vm1241_vm8, %v1122_v18, %v1291_v23 }
 0x317   :  { %v1342_v28 = vsel %vm1242_vm9, %v1124_v21, %v1292_v25 }
 0x318   :  { %v1129_v29 = vpop.f32.mrb[60].mxu0  ;;  %v1343_v31 = vsel %vm1243_vm10, %v1126_v24, %v1293_v26  ;;  %v1388_v32 = vpack.c.bf16 %v1342_v28, %v1340_v27 }
 0x319   :  { %v1130_v33 = vadd.f32 %v1129_v29, %v3561_v55  ;;  %v1131_v34 = vpop.f32.mrb[61].mxu0  ;;  %v1389_v35 = vpack.c.bf16 %v1343_v31, %v1341_v30 }
 0x31a   :  { %v1132_v36 = vadd.f32 %v1131_v34, %v3565_v61  ;;  %v1133_v38 = vpop.f32.mrb[62].mxu0 }
 0x31b   :  { %v1294_v39 = vmul.f32 0.01, %v1130_v33  ;;  %v1134_v40 = vadd.f32 %v1133_v38, %v3561_v55  ;;  %v1135_v41 = vpop.f32.mrb[63].mxu0  ;;  %1587 = vmatprep.mubr.bf16.mxu1 %v1389_v35  ;;  %vm1244_vm11 = vcmp.gt.f32.partialorder %v1130_v33, 0.0 }
 0x31c   :  { %v1295_v42 = vmul.f32 0.01, %v1132_v36  ;;  %v1136_v43 = vadd.f32 %v1135_v41, %v3565_v61  ;;  %1588 = vmatmul.mubr.bf16.gmra.mrb[56].mxu1 %v1388_v32  ;;  %vm1245_vm12 = vcmp.gt.f32.partialorder %v1132_v36, 0.0 }
 0x31d   :  { %vm1246_vm13 = vcmp.gt.f32.partialorder %v1134_v40, 0.0  ;;  %v1296_v44 = vmul.f32 0.01, %v1134_v40  ;;  %v1344_v46 = vsel %vm1244_vm11, %v1130_v33, %v1294_v39 }
 0x31e   :  { %vm1247_vm14 = vcmp.gt.f32.partialorder %v1136_v43, 0.0  ;;  %v1297_v54 = vmul.f32 0.01, %v1136_v43  ;;  %v1345_v51 = vsel %vm1245_vm12, %v1132_v36, %v1295_v42 }
 0x31f   :  { %v1346_v47 = vsel %vm1246_vm13, %v1134_v40, %v1296_v44 }
 0x320   :  { %v1139_v49 = vpop.f32.mrb[64].mxu0  ;;  %v1347_v52 = vsel %vm1247_vm14, %v1136_v43, %v1297_v54  ;;  %v1390_v56 = vpack.c.bf16 %v1346_v47, %v1344_v46 }
 0x321   :  { %v1140_v57 = vadd.f32 %v1139_v49, %v3561_v55  ;;  %v1141_v58 = vpop.f32.mrb[65].mxu0  ;;  %v1391_v59 = vpack.c.bf16 %v1347_v52, %v1345_v51 }
 0x322   :  { %v1142_v60 = vadd.f32 %v1141_v58, %v3565_v61  ;;  %v1143_v53 = vpop.f32.mrb[66].mxu0 }
 0x323   :  { %v1298_v62 = vmul.f32 0.01, %v1140_v57  ;;  %v1144_v63 = vadd.f32 %v1143_v53, %v3561_v55  ;;  %v1145_v1 = vpop.f32.mrb[67].mxu0  ;;  %1595 = vmatprep.mubr.bf16.mxu1 %v1391_v59  ;;  %vm1248_vm15 = vcmp.gt.f32.partialorder %v1140_v57, 0.0 }
 0x324   :  { %v1299_v2 = vmul.f32 0.01, %v1142_v60  ;;  %v1146_v3 = vadd.f32 %v1145_v1, %v3565_v61  ;;  %1596 = vmatmul.mubr.bf16.gmra.mrb[60].mxu1 %v1390_v56  ;;  %vm1249_vm0 = vcmp.gt.f32.partialorder %v1142_v60, 0.0 }
 0x325   :  { %vm1250_vm1 = vcmp.gt.f32.partialorder %v1144_v63, 0.0  ;;  %v1300_v4 = vmul.f32 0.01, %v1144_v63  ;;  %v1348_v6 = vsel %vm1248_vm15, %v1140_v57, %v1298_v62 }
 0x326   :  { %vm1251_vm2 = vcmp.gt.f32.partialorder %v1146_v3, 0.0  ;;  %v1301_v5 = vmul.f32 0.01, %v1146_v3  ;;  %v1349_v8 = vsel %vm1249_vm0, %v1142_v60, %v1299_v2 }
 0x327   :  { %v1350_v7 = vsel %vm1250_vm1, %v1144_v63, %v1300_v4 }
 0x328   :  { %v1149_v48 = vpop.f32.mrb[68].mxu0  ;;  %v1351_v50 = vsel %vm1251_vm2, %v1146_v3, %v1301_v5  ;;  %v1392_v9 = vpack.c.bf16 %v1350_v7, %v1348_v6 }
 0x329   :  { %v1150_v10 = vadd.f32 %v1149_v48, %v3561_v55  ;;  %v1151_v11 = vpop.f32.mrb[69].mxu0  ;;  %v1393_v12 = vpack.c.bf16 %v1351_v50, %v1349_v8 }
 0x32a   :  { %v1152_v13 = vadd.f32 %v1151_v11, %v3565_v61  ;;  %v1153_v14 = vpop.f32.mrb[70].mxu0 }
 0x32b   :  { %v1302_v15 = vmul.f32 0.01, %v1150_v10  ;;  %v1154_v16 = vadd.f32 %v1153_v14, %v3561_v55  ;;  %v1155_v17 = vpop.f32.mrb[71].mxu0  ;;  %1603 = vmatprep.mubr.bf16.mxu1 %v1393_v12  ;;  %vm1252_vm3 = vcmp.gt.f32.partialorder %v1150_v10, 0.0 }
 0x32c   :  { %v1303_v18 = vmul.f32 0.01, %v1152_v13  ;;  %v1156_v19 = vadd.f32 %v1155_v17, %v3565_v61  ;;  %1604 = vmatmul.mubr.bf16.gmra.mrb[64].mxu1 %v1392_v9  ;;  %vm1253_vm4 = vcmp.gt.f32.partialorder %v1152_v13, 0.0 }
 0x32d   :  { %vm1254_vm5 = vcmp.gt.f32.partialorder %v1154_v16, 0.0  ;;  %v1304_v20 = vmul.f32 0.01, %v1154_v16  ;;  %v1352_v22 = vsel %vm1252_vm3, %v1150_v10, %v1302_v15 }
 0x32e   :  { %vm1255_vm6 = vcmp.gt.f32.partialorder %v1156_v19, 0.0  ;;  %v1305_v21 = vmul.f32 0.01, %v1156_v19  ;;  %v1353_v25 = vsel %vm1253_vm4, %v1152_v13, %v1303_v18 }
 0x32f   :  { %v1354_v23 = vsel %vm1254_vm5, %v1154_v16, %v1304_v20 }
 0x330   :  { %v1159_v24 = vpop.f32.mrb[72].mxu0  ;;  %v1355_v26 = vsel %vm1255_vm6, %v1156_v19, %v1305_v21  ;;  %v1394_v27 = vpack.c.bf16 %v1354_v23, %v1352_v22 }
 0x331   :  { %v1160_v28 = vadd.f32 %v1159_v24, %v3561_v55  ;;  %v1161_v29 = vpop.f32.mrb[73].mxu0  ;;  %v1395_v30 = vpack.c.bf16 %v1355_v26, %v1353_v25 }
 0x332   :  { %v1162_v31 = vadd.f32 %v1161_v29, %v3565_v61  ;;  %v1163_v32 = vpop.f32.mrb[74].mxu0 }
 0x333   :  { %v1306_v33 = vmul.f32 0.01, %v1160_v28  ;;  %v1164_v34 = vadd.f32 %v1163_v32, %v3561_v55  ;;  %v1165_v35 = vpop.f32.mrb[75].mxu0  ;;  %1611 = vmatprep.mubr.bf16.mxu1 %v1395_v30  ;;  %vm1256_vm7 = vcmp.gt.f32.partialorder %v1160_v28, 0.0 }
 0x334   :  { %v1307_v36 = vmul.f32 0.01, %v1162_v31  ;;  %v1166_v38 = vadd.f32 %v1165_v35, %v3565_v61  ;;  %1612 = vmatmul.mubr.bf16.gmra.mrb[68].mxu1 %v1394_v27  ;;  %vm1257_vm8 = vcmp.gt.f32.partialorder %v1162_v31, 0.0 }
 0x335   :  { %vm1258_vm9 = vcmp.gt.f32.partialorder %v1164_v34, 0.0  ;;  %v1308_v39 = vmul.f32 0.01, %v1164_v34  ;;  %v1356_v41 = vsel %vm1256_vm7, %v1160_v28, %v1306_v33 }
 0x336   :  { %vm1259_vm10 = vcmp.gt.f32.partialorder %v1166_v38, 0.0  ;;  %v1309_v40 = vmul.f32 0.01, %v1166_v38  ;;  %v1357_v44 = vsel %vm1257_vm8, %v1162_v31, %v1307_v36 }
 0x337   :  { %v1358_v42 = vsel %vm1258_vm9, %v1164_v34, %v1308_v39 }
 0x338   :  { %v1169_v43 = vpop.f32.mrb[76].mxu0  ;;  %v1359_v54 = vsel %vm1259_vm10, %v1166_v38, %v1309_v40  ;;  %v1396_v46 = vpack.c.bf16 %v1358_v42, %v1356_v41 }
 0x339   :  { %v1170_v47 = vadd.f32 %v1169_v43, %v3561_v55  ;;  %v1171_v49 = vpop.f32.mrb[77].mxu0  ;;  %v1397_v51 = vpack.c.bf16 %v1359_v54, %v1357_v44 }
 0x33a   :  { %v1172_v52 = vadd.f32 %v1171_v49, %v3565_v61  ;;  %v1173_v56 = vpop.f32.mrb[78].mxu0 }
 0x33b   :  { %v1310_v57 = vmul.f32 0.01, %v1170_v47  ;;  %v1174_v58 = vadd.f32 %v1173_v56, %v3561_v55  ;;  %v1175_v59 = vpop.f32.mrb[79].mxu0  ;;  %1619 = vmatprep.mubr.bf16.mxu1 %v1397_v51  ;;  %vm1260_vm11 = vcmp.gt.f32.partialorder %v1170_v47, 0.0 }
 0x33c   :  { %v1311_v60 = vmul.f32 0.01, %v1172_v52  ;;  %v1176_v53 = vadd.f32 %v1175_v59, %v3565_v61  ;;  %1620 = vmatmul.mubr.bf16.gmra.mrb[72].mxu1 %v1396_v46  ;;  %vm1261_vm12 = vcmp.gt.f32.partialorder %v1172_v52, 0.0 }
 0x33d   :  { %vm1262_vm13 = vcmp.gt.f32.partialorder %v1174_v58, 0.0  ;;  %v1312_v62 = vmul.f32 0.01, %v1174_v58  ;;  %v1360_v1 = vsel %vm1260_vm11, %v1170_v47, %v1310_v57 }
 0x33e   :  { %vm1263_vm14 = vcmp.gt.f32.partialorder %v1176_v53, 0.0  ;;  %v1313_v63 = vmul.f32 0.01, %v1176_v53  ;;  %v1361_v4 = vsel %vm1261_vm12, %v1172_v52, %v1311_v60 }
 0x33f   :  { %v1362_v2 = vsel %vm1262_vm13, %v1174_v58, %v1312_v62 }
 0x340   :  { %v1179_v3 = vpop.f32.mrb[80].mxu0  ;;  %v1363_v5 = vsel %vm1263_vm14, %v1176_v53, %v1313_v63  ;;  %v1398_v6 = vpack.c.bf16 %v1362_v2, %v1360_v1 }
 0x341   :  { %v1180_v7 = vadd.f32 %v1179_v3, %v3561_v55  ;;  %v1181_v48 = vpop.f32.mrb[81].mxu0  ;;  %v1399_v8 = vpack.c.bf16 %v1363_v5, %v1361_v4 }
 0x342   :  { %v1182_v50 = vadd.f32 %v1181_v48, %v3565_v61  ;;  %v1183_v9 = vpop.f32.mrb[82].mxu0 }
 0x343   :  { %v1314_v10 = vmul.f32 0.01, %v1180_v7  ;;  %v1184_v11 = vadd.f32 %v1183_v9, %v3561_v55  ;;  %v1185_v12 = vpop.f32.mrb[83].mxu0  ;;  %1627 = vmatprep.mubr.bf16.mxu1 %v1399_v8  ;;  %vm1264_vm15 = vcmp.gt.f32.partialorder %v1180_v7, 0.0 }
 0x344   :  { %v1315_v13 = vmul.f32 0.01, %v1182_v50  ;;  %v1186_v14 = vadd.f32 %v1185_v12, %v3565_v61  ;;  %1628 = vmatmul.mubr.bf16.gmra.mrb[76].mxu1 %v1398_v6  ;;  %vm1265_vm0 = vcmp.gt.f32.partialorder %v1182_v50, 0.0 }
 0x345   :  { %vm1266_vm1 = vcmp.gt.f32.partialorder %v1184_v11, 0.0  ;;  %v1316_v15 = vmul.f32 0.01, %v1184_v11  ;;  %v1364_v17 = vsel %vm1264_vm15, %v1180_v7, %v1314_v10 }
 0x346   :  { %vm1267_vm2 = vcmp.gt.f32.partialorder %v1186_v14, 0.0  ;;  %v1317_v16 = vmul.f32 0.01, %v1186_v14  ;;  %v1365_v20 = vsel %vm1265_vm0, %v1182_v50, %v1315_v13 }
 0x347   :  { %v1366_v18 = vsel %vm1266_vm1, %v1184_v11, %v1316_v15 }
 0x348   :  { %v1189_v19 = vpop.f32.mrb[84].mxu0  ;;  %v1367_v21 = vsel %vm1267_vm2, %v1186_v14, %v1317_v16  ;;  %v1400_v22 = vpack.c.bf16 %v1366_v18, %v1364_v17 }
 0x349   :  { %v1190_v23 = vadd.f32 %v1189_v19, %v3561_v55  ;;  %v1191_v24 = vpop.f32.mrb[85].mxu0  ;;  %v1401_v25 = vpack.c.bf16 %v1367_v21, %v1365_v20 }
 0x34a   :  { %v1192_v26 = vadd.f32 %v1191_v24, %v3565_v61  ;;  %v1193_v27 = vpop.f32.mrb[86].mxu0 }
 0x34b   :  { %v1318_v28 = vmul.f32 0.01, %v1190_v23  ;;  %v1194_v29 = vadd.f32 %v1193_v27, %v3561_v55  ;;  %v1195_v30 = vpop.f32.mrb[87].mxu0  ;;  %1635 = vmatprep.mubr.bf16.mxu1 %v1401_v25  ;;  %vm1268_vm3 = vcmp.gt.f32.partialorder %v1190_v23, 0.0 }
 0x34c   :  { %v1319_v31 = vmul.f32 0.01, %v1192_v26  ;;  %v1196_v32 = vadd.f32 %v1195_v30, %v3565_v61  ;;  %1636 = vmatmul.mubr.bf16.gmra.mrb[80].mxu1 %v1400_v22  ;;  %vm1269_vm4 = vcmp.gt.f32.partialorder %v1192_v26, 0.0 }
 0x34d   :  { %vm1270_vm5 = vcmp.gt.f32.partialorder %v1194_v29, 0.0  ;;  %v1320_v33 = vmul.f32 0.01, %v1194_v29  ;;  %v1368_v35 = vsel %vm1268_vm3, %v1190_v23, %v1318_v28 }
 0x34e   :  { %vm1271_vm6 = vcmp.gt.f32.partialorder %v1196_v32, 0.0  ;;  %v1321_v34 = vmul.f32 0.01, %v1196_v32  ;;  %v1369_v39 = vsel %vm1269_vm4, %v1192_v26, %v1319_v31 }
 0x34f   :  { %v1370_v36 = vsel %vm1270_vm5, %v1194_v29, %v1320_v33 }
 0x350   :  { %v1199_v38 = vpop.f32.mrb[88].mxu0  ;;  %v1371_v40 = vsel %vm1271_vm6, %v1196_v32, %v1321_v34  ;;  %v1402_v41 = vpack.c.bf16 %v1370_v36, %v1368_v35 }
 0x351   :  { %v1200_v42 = vadd.f32 %v1199_v38, %v3561_v55  ;;  %v1201_v43 = vpop.f32.mrb[89].mxu0  ;;  %v1403_v44 = vpack.c.bf16 %v1371_v40, %v1369_v39 }
 0x352   :  { %v1202_v54 = vadd.f32 %v1201_v43, %v3565_v61  ;;  %v1203_v46 = vpop.f32.mrb[90].mxu0 }
 0x353   :  { %v1322_v47 = vmul.f32 0.01, %v1200_v42  ;;  %v1204_v49 = vadd.f32 %v1203_v46, %v3561_v55  ;;  %v1205_v51 = vpop.f32.mrb[91].mxu0  ;;  %1643 = vmatprep.mubr.bf16.mxu1 %v1403_v44  ;;  %vm1272_vm7 = vcmp.gt.f32.partialorder %v1200_v42, 0.0 }
 0x354   :  { %v1323_v52 = vmul.f32 0.01, %v1202_v54  ;;  %v1206_v56 = vadd.f32 %v1205_v51, %v3565_v61  ;;  %1644 = vmatmul.mubr.bf16.gmra.mrb[84].mxu1 %v1402_v41  ;;  %vm1273_vm8 = vcmp.gt.f32.partialorder %v1202_v54, 0.0 }
 0x355   :  { %vm1274_vm9 = vcmp.gt.f32.partialorder %v1204_v49, 0.0  ;;  %v1324_v57 = vmul.f32 0.01, %v1204_v49  ;;  %v1372_v59 = vsel %vm1272_vm7, %v1200_v42, %v1322_v47 }
 0x356   :  { %vm1275_vm10 = vcmp.gt.f32.partialorder %v1206_v56, 0.0  ;;  %v1325_v58 = vmul.f32 0.01, %v1206_v56  ;;  %v1373_v62 = vsel %vm1273_vm8, %v1202_v54, %v1323_v52 }
 0x357   :  { %v1374_v60 = vsel %vm1274_vm9, %v1204_v49, %v1324_v57 }
 0x358   :  { %v1209_v53 = vpop.f32.mrb[92].mxu0  ;;  %v1375_v63 = vsel %vm1275_vm10, %v1206_v56, %v1325_v58  ;;  %v1404_v1 = vpack.c.bf16 %v1374_v60, %v1372_v59 }
 0x359   :  { %v1210_v2 = vadd.f32 %v1209_v53, %v3561_v55  ;;  %v1211_v3 = vpop.f32.mrb[93].mxu0  ;;  %v1405_v4 = vpack.c.bf16 %v1375_v63, %v1373_v62 }
 0x35a   :  { %v1212_v5 = vadd.f32 %v1211_v3, %v3565_v61  ;;  %v1213_v6 = vpop.f32.mrb[94].mxu0 }
 0x35b   :  { %v1326_v7 = vmul.f32 0.01, %v1210_v2  ;;  %v1214_v48 = vadd.f32 %v1213_v6, %v3561_v55  ;;  %v1215_v8 = vpop.f32.mrb[95].mxu0  ;;  %1651 = vmatprep.mubr.bf16.mxu1 %v1405_v4  ;;  %vm1276_vm11 = vcmp.gt.f32.partialorder %v1210_v2, 0.0 }
 0x35c   :  { %v1327_v50 = vmul.f32 0.01, %v1212_v5  ;;  %v1216_v9 = vadd.f32 %v1215_v8, %v3565_v61  ;;  %1652 = vmatmul.mubr.bf16.gmra.mrb[88].mxu1 %v1404_v1  ;;  %vm1277_vm12 = vcmp.gt.f32.partialorder %v1212_v5, 0.0 }
 0x35d   :  { %vm1278_vm13 = vcmp.gt.f32.partialorder %v1214_v48, 0.0  ;;  %v1328_v10 = vmul.f32 0.01, %v1214_v48  ;;  %v1376_v12 = vsel %vm1276_vm11, %v1210_v2, %v1326_v7 }
 0x35e   :  { %vm1279_vm14 = vcmp.gt.f32.partialorder %v1216_v9, 0.0  ;;  %v1329_v11 = vmul.f32 0.01, %v1216_v9  ;;  %v1377_v15 = vsel %vm1277_vm12, %v1212_v5, %v1327_v50 }
 0x35f   :  { %v1378_v13 = vsel %vm1278_vm13, %v1214_v48, %v1328_v10 }
 0x360   :  { %v1219_v14 = vpop.f32.mrb[96].mxu0  ;;  %v1379_v16 = vsel %vm1279_vm14, %v1216_v9, %v1329_v11  ;;  %v1406_v17 = vpack.c.bf16 %v1378_v13, %v1376_v12 }
 0x361   :  { %v1220_v18 = vadd.f32 %v1219_v14, %v3561_v55  ;;  %v1221_v19 = vpop.f32.mrb[97].mxu0  ;;  %v1407_v20 = vpack.c.bf16 %v1379_v16, %v1377_v15 }
 0x362   :  { %v1222_v21 = vadd.f32 %v1221_v19, %v3565_v61  ;;  %v1223_v22 = vpop.f32.mrb[98].mxu0 }
 0x363   :  { %v1330_v23 = vmul.f32 0.01, %v1220_v18  ;;  %v1224_v24 = vadd.f32 %v1223_v22, %v3561_v55  ;;  %v1225_v25 = vpop.f32.mrb[99].mxu0  ;;  %1659 = vmatprep.mubr.bf16.mxu1 %v1407_v20  ;;  %vm1280_vm15 = vcmp.gt.f32.partialorder %v1220_v18, 0.0 }
 0x364   :  { %v1331_v26 = vmul.f32 0.01, %v1222_v21  ;;  %v1226_v27 = vadd.f32 %v1225_v25, %v3565_v61  ;;  %1660 = vmatmul.mubr.bf16.gmra.mrb[92].mxu1 %v1406_v17  ;;  %vm1281_vm0 = vcmp.gt.f32.partialorder %v1222_v21, 0.0  ;;  %v1699_v25 = vadd.s32 96, %v3491_v45 }
 0x365   :  { %vm1282_vm1 = vcmp.gt.f32.partialorder %v1224_v24, 0.0  ;;  %v1332_v28 = vmul.f32 0.01, %v1224_v24  ;;  %v1380_v30 = vsel %vm1280_vm15, %v1220_v18, %v1330_v23 }
 0x366   :  { %vm1283_vm2 = vcmp.gt.f32.partialorder %v1226_v27, 0.0  ;;  %v1333_v29 = vmul.f32 0.01, %v1226_v27  ;;  %v1381_v33 = vsel %vm1281_vm0, %v1222_v21, %v1331_v26  ;;  %v3644_v26 = vand.u32 127, %v444_v37 }
 0x367   :  { %v1382_v31 = vsel %vm1282_vm1, %v1224_v24, %v1332_v28  ;;  %vm1751_vm5 = vcmp.ge.s32.totalorder %v1699_v25, 99 }
 0x368   :  { %v1229_v32 = vpop.f32.mrb[100].mxu0  ;;  %v1383_v34 = vsel %vm1283_vm2, %v1226_v27, %v1333_v29  ;;  %v1408_v35 = vpack.c.bf16 %v1382_v31, %v1380_v30  ;;  %vm1685_vm6 = vcmp.eq.s32.totalorder %v3644_v26, 0 }
 0x369   :  { %v1230_v36 = vadd.f32 %v1229_v32, %v3561_v55  ;;  %v1231_v38 = vpop.f32.mrb[101].mxu0  ;;  %v1409_v39 = vpack.c.bf16 %v1383_v34, %v1381_v33  ;;  %v3620_v55 = vld [vmem:[%s4060_s8] ss:$0 sm:$0xff] }
 0x36a   :  { %v1232_v40 = vadd.f32 %v1231_v38, %v3565_v61  ;;  %v1233_v41 = vpop.f32.mrb[102].mxu0 }
 0x36b   :  { %v1334_v42 = vmul.f32 0.01, %v1230_v36  ;;  %v1234_v43 = vpop.f32.mrb[103].mxu0  ;;  %1667 = vmatprep.mubr.bf16.mxu1 %v1409_v39  ;;  %vm1284_vm3 = vcmp.gt.f32.partialorder %v1230_v36, 0.0 }
 0x36c   :  { %vm1285_vm4 = vcmp.gt.f32.partialorder %v1232_v40, 0.0  ;;  %v1335_v44 = vmul.f32 0.01, %v1232_v40  ;;  %1668 = vmatmul.mubr.bf16.gmra.mrb[96].mxu1 %v1408_v35 }
 0x36d   :  { %v1384_v47 = vsel %vm1284_vm3, %v1230_v36, %v1334_v42 }
 0x36e   :  { %v1385_v54 = vsel %vm1285_vm4, %v1232_v40, %v1335_v44  ;;  %v1410_v49 = vpack.c.bf16 %v1384_v47, %v1384_v47 }
 0x36f   :  { %v1411_v46 = vpack.c.bf16 %v1385_v54, %v1385_v54 }
 0x371   :  { %1675 = vmatprep.mubr.bf16.mxu1 %v1411_v46 }
 0x374   :  { %1676 = vmatmul.mubr.bf16.gmra.mrb[100].mxu1 %v1410_v49 }
 0x3e7   :  { %v2633_v51 = vpop.f32.mrb[52].mxu1 }
 0x3e8   :  { %v2634_v61 = vpop.f32.mrb[53].mxu1 }
 0x3e9   :  { %v2635_v52 = vadd.f32 %v2634_v61, %v2633_v51  ;;  %v2636_v56 = vpop.f32.mrb[54].mxu1  ;;  %v3659_v51 = vsel %vm1751_vm5, 1.0, %v3278_v0 }
 0x3ea   :  { %v2637_v57 = vpop.f32.mrb[55].mxu1 }
 0x3eb   :  { %v3623_v58 = vadd.f32 %v2635_v52, %v3620_v55  ;;  %v2638_v59 = vadd.f32 %v2637_v57, %v2636_v56 }
 0x3ed   :  { %v1889_v60 = vsub.f32 0.0, %v3623_v58  ;;  %v2139_v53 = vand.u32 2147483647, %v3623_v58  ;;  %v3628_v62 = vadd.f32 %v2638_v59, %v3620_v55  ;;  %v2114_v61 = vmax.f32 %v3623_v58, 0.0 }
 0x3ef   :  { %v1914_v63 = vmul.f32 1.442695, %v1889_v60  ;;  %v2164_v1 = vsub.f32 0.0, %v2139_v53  ;;  %v2639_v2 = vpop.f32.mrb[56].mxu1  ;;  %v1890_v3 = vsub.f32 0.0, %v3628_v62 }
 0x3f0   :  { %v2140_v4 = vand.u32 2147483647, %v3628_v62  ;;  %v2640_v5 = vpop.f32.mrb[57].mxu1 }
 0x3f1   :  { %2904 = vpow2.f32 %v1914_v63  ;;  %v2189_v6 = vmul.f32 1.442695, %v2164_v1  ;;  %v2641_v7 = vadd.f32 %v2640_v5, %v2639_v2  ;;  %v2642_v48 = vpop.f32.mrb[58].mxu1  ;;  %v1916_v8 = vmul.f32 1.442695, %v1890_v3 }
 0x3f2   :  { %v2165_v50 = vsub.f32 0.0, %v2140_v4  ;;  %v2643_v9 = vpop.f32.mrb[59].mxu1  ;;  %v3663_v2 = vmul.f32 0.0, %v3623_v58  ;;  %v2115_v3 = vmax.f32 %v3628_v62, 0.0 }
 0x3f3   :  { %2906 = vpow2.f32 %v2189_v6  ;;  %v3633_v10 = vadd.f32 %v2641_v7, %v3620_v55  ;;  %v2644_v11 = vadd.f32 %v2643_v9, %v2642_v48 }
 0x3f4   :  { %2908 = vpow2.f32 %v1916_v8  ;;  %v2191_v12 = vmul.f32 1.442695, %v2165_v50  ;;  %v3670_v8 = vmul.f32 0.0, %v3628_v62 }
 0x3f5   :  { %v1891_v13 = vsub.f32 0.0, %v3633_v10  ;;  %v2141_v14 = vand.u32 2147483647, %v3633_v10  ;;  %v3638_v15 = vadd.f32 %v2644_v11, %v3620_v55  ;;  %v2116_v50 = vmax.f32 %v3633_v10, 0.0 }
 0x3f6   :  { %2910 = vpow2.f32 %v2191_v12 }
 0x3f7   :  { %v1918_v16 = vmul.f32 1.442695, %v1891_v13  ;;  %v2166_v17 = vsub.f32 0.0, %v2141_v14  ;;  %v2645_v18 = vpop.f32.mrb[60].mxu1  ;;  %v1892_v19 = vsub.f32 0.0, %v3638_v15  ;;  %v3677_v13 = vmul.f32 0.0, %v3633_v10 }
 0x3f8   :  { %v2142_v20 = vand.u32 2147483647, %v3638_v15  ;;  %v2646_v21 = vpop.f32.mrb[61].mxu1 }
 0x3f9   :  { %2912 = vpow2.f32 %v1918_v16  ;;  %v2193_v22 = vmul.f32 1.442695, %v2166_v17  ;;  %v2647_v23 = vadd.f32 %v2646_v21, %v2645_v18  ;;  %v2648_v24 = vpop.f32.mrb[62].mxu1  ;;  %v1920_v27 = vmul.f32 1.442695, %v1892_v19 }
 0x3fa   :  { %v2167_v28 = vsub.f32 0.0, %v2142_v20  ;;  %v2649_v29 = vpop.f32.mrb[63].mxu1  ;;  %v2117_v17 = vmax.f32 %v3638_v15, 0.0  ;;  %v3683_v21 = vmul.f32 0.0, %v3638_v15 }
 0x3fb   :  { %v2905_v30 = vpop.eup %2904  ;;  %2914 = vpow2.f32 %v2193_v22  ;;  %v3647_v31 = vadd.f32 %v2647_v23, %v3620_v55  ;;  %v2650_v32 = vadd.f32 %v2649_v29, %v2648_v24 }
 0x3fc   :  { %v1964_v33 = vadd.f32 1.0, %v2905_v30  ;;  %2916 = vpow2.f32 %v1920_v27  ;;  %v2195_v34 = vmul.f32 1.442695, %v2167_v28 }
 0x3fd   :  { %v2907_v35 = vpop.eup %2906  ;;  %v1893_v36 = vsub.f32 0.0, %v3647_v31  ;;  %v2143_v38 = vand.u32 2147483647, %v3647_v31  ;;  %v3653_v40 = vadd.f32 %v2650_v32, %v3620_v55 }
 0x3fe   :  { %v2909_v37 = vpop.eup %2908  ;;  %2918 = vrcp.f32 %v1964_v33  ;;  %v2239_v39 = vadd.f32 1.0, %v2907_v35 }
 0x3ff   :  { %v1965_v41 = vadd.f32 1.0, %v2909_v37  ;;  %2920 = vpow2.f32 %v2195_v34  ;;  %v1922_v42 = vmul.f32 1.442695, %v1893_v36  ;;  %v2168_v43 = vsub.f32 0.0, %v2143_v38  ;;  %v2651_v44 = vpop.f32.mrb[64].mxu1 }
 0x400   :  { %v2911_v54 = vpop.eup %2910  ;;  %2922 = vlog2.f32 %v2239_v39  ;;  %v1894_v46 = vsub.f32 0.0, %v3653_v40  ;;  %v2144_v47 = vand.u32 2147483647, %v3653_v40  ;;  %v2652_v49 = vpop.f32.mrb[65].mxu1  ;;  %v2118_v34 = vmax.f32 %v3647_v31, 0.0 }
 0x401   :  { %2924 = vrcp.f32 %v1965_v41  ;;  %v2240_v52 = vadd.f32 1.0, %v2911_v54  ;;  %v2197_v56 = vmul.f32 1.442695, %v2168_v43  ;;  %v2654_v57 = vpop.f32.mrb[66].mxu1  ;;  %v2653_v53 = vadd.f32 %v2652_v49, %v2651_v44 }
 0x402   :  { %2926 = vpow2.f32 %v1922_v42  ;;  %v1924_v59 = vmul.f32 1.442695, %v1894_v46  ;;  %v2169_v60 = vsub.f32 0.0, %v2144_v47  ;;  %v2655_v63 = vpop.f32.mrb[67].mxu1  ;;  %v3693_v54 = vmul.f32 0.0, %v3647_v31 }
 0x403   :  { %v2913_v1 = vpop.eup %2912  ;;  %2928 = vlog2.f32 %v2240_v52  ;;  %v2656_v4 = vadd.f32 %v2655_v63, %v2654_v57  ;;  %v3667_v7 = vadd.f32 %v2653_v53, %v3620_v55 }
 0x404   :  { %v1966_v5 = vadd.f32 1.0, %v2913_v1  ;;  %2930 = vpow2.f32 %v2197_v56  ;;  %v2199_v6 = vmul.f32 1.442695, %v2169_v60  ;;  %v2119_v60 = vmax.f32 %v3653_v40, 0.0 }
 0x405   :  { %v2915_v48 = vpop.eup %2914  ;;  %2932 = vpow2.f32 %v1924_v59  ;;  %v3674_v9 = vadd.f32 %v2656_v4, %v3620_v55  ;;  %v1895_v14 = vsub.f32 0.0, %v3667_v7  ;;  %v2145_v18 = vand.u32 2147483647, %v3667_v7 }
 0x406   :  { %v2917_v11 = vpop.eup %2916  ;;  %2934 = vrcp.f32 %v1966_v5  ;;  %v2241_v12 = vadd.f32 1.0, %v2915_v48 }
 0x407   :  { %v1967_v16 = vadd.f32 1.0, %v2917_v11  ;;  %2936 = vpow2.f32 %v2199_v6  ;;  %v2657_v19 = vpop.f32.mrb[68].mxu1  ;;  %v1926_v22 = vmul.f32 1.442695, %v1895_v14  ;;  %v1896_v23 = vsub.f32 0.0, %v3674_v9 }
 0x408   :  { %v2919_v20 = vpop.eup %2918  ;;  %2938 = vlog2.f32 %v2241_v12  ;;  %v2658_v24 = vpop.f32.mrb[69].mxu1  ;;  %v2170_v28 = vsub.f32 0.0, %v2145_v18  ;;  %v2146_v29 = vand.u32 2147483647, %v3674_v9  ;;  %v2120_v18 = vmax.f32 %v3667_v7, 0.0 }
 0x409   :  { %v2921_v25 = vpop.eup %2920  ;;  %v2064_v27 = vsel %vm1685_vm6, %v2919_v20, 0.0  ;;  %2940 = vrcp.f32 %v1967_v16  ;;  %v2660_v30 = vpop.f32.mrb[70].mxu1  ;;  %v1928_v35 = vmul.f32 1.442695, %v1896_v23  ;;  %v2659_v42 = vadd.f32 %v2658_v24, %v2657_v19 }
 0x40a   :  { %v2923_v32 = vpop.eup %2922  ;;  %2089 = vst [vmem:[#allocation11] sm:$0xff] %v2064_v27  ;;  %v2242_v33 = vadd.f32 1.0, %v2921_v25  ;;  %2942 = vpow2.f32 %v1926_v22  ;;  %v2661_v36 = vpop.f32.mrb[71].mxu1  ;;  %v2201_v39 = vmul.f32 1.442695, %v2170_v28  ;;  %v2171_v41 = vsub.f32 0.0, %v2146_v29 }
 0x40b   :  { %v2925_v38 = vpop.eup %2924  ;;  %v2265_v37 = vmul.f32 0.6931472, %v2923_v32  ;;  %v2662_v46 = vadd.f32 %v2661_v36, %v2660_v30  ;;  %v3699_v53 = vadd.f32 %v2659_v42, %v3620_v55  ;;  %v3720_v27 = vmul.f32 0.0, %v3667_v7 }
 0x40c   :  { %v2927_v43 = vpop.eup %2926  ;;  %v2065_v44 = vsel %vm1685_vm6, %v2925_v38, 0.0  ;;  %2944 = vlog2.f32 %v2242_v33  ;;  %v2203_v56 = vmul.f32 1.442695, %v2171_v41 }
 0x40d   :  { %v2929_v47 = vpop.eup %2928  ;;  %v2314_v49 = vadd.f32 %v2265_v37, %v2114_v61  ;;  %2090 = vst [vmem:[#allocation11 + $0x8] sm:$0xff] %v2065_v44  ;;  %v1968_v52 = vadd.f32 1.0, %v2927_v43  ;;  %2946 = vpow2.f32 %v2201_v39  ;;  %v3703_v58 = vadd.f32 %v2662_v46, %v3620_v55 }
 0x40e   :  { %v2931_v57 = vpop.eup %2930  ;;  %v2267_v59 = vmul.f32 0.6931472, %v2929_v47  ;;  %2948 = vpow2.f32 %v1928_v35  ;;  %v1897_v11 = vsub.f32 0.0, %v3699_v53  ;;  %v2147_v28 = vand.u32 2147483647, %v3699_v53 }
 0x40f   :  { %v2933_v63 = vpop.eup %2932  ;;  %v2364_v1 = vsub.f32 %v2314_v49, %v3663_v2  ;;  %2950 = vrcp.f32 %v1968_v52  ;;  %v2243_v4 = vadd.f32 1.0, %v2931_v57  ;;  %v2663_v61 = vpop.f32.mrb[72].mxu1  ;;  %v3711_v2 = vmul.f32 0.0, %v3653_v40 }
 0x410   :  { %v2935_v5 = vpop.eup %2934  ;;  %v2315_v6 = vadd.f32 %v2267_v59, %v2115_v3  ;;  %v1969_v48 = vadd.f32 1.0, %v2933_v63  ;;  %2952 = vpow2.f32 %v2203_v56  ;;  %v2664_v12 = vpop.f32.mrb[73].mxu1  ;;  %v1930_v22 = vmul.f32 1.442695, %v1897_v11 }
 0x411   :  { %v2937_v14 = vpop.eup %2936  ;;  %v2066_v16 = vsel %vm1685_vm6, %v2935_v5, 0.0  ;;  %2954 = vlog2.f32 %v2243_v4  ;;  %v3714_v19 = vpop.f32.mrb[74].mxu1  ;;  %v1898_v29 = vsub.f32 0.0, %v3703_v58  ;;  %v2414_v32 = vsel %vm1685_vm6, %v2364_v1, 0.0 }
 0x412   :  { %v2939_v20 = vpop.eup %2938  ;;  %v2365_v62 = vsub.f32 %v2315_v6, %v3670_v8  ;;  %2091 = vst [vmem:[#allocation11 + $0x10] sm:$0xff] %v2066_v16  ;;  %2956 = vrcp.f32 %v1969_v48  ;;  %v2244_v3 = vadd.f32 1.0, %v2937_v14  ;;  %v3717_v23 = vpop.f32.mrb[75].mxu1  ;;  %v2121_v39 = vmax.f32 %v3674_v9, 0.0 }
 0x413   :  { %v2941_v24 = vpop.eup %2940  ;;  %v2269_v25 = vmul.f32 0.6931472, %v2939_v20  ;;  %v2172_v41 = vsub.f32 0.0, %v2147_v28  ;;  %v1932_v42 = vmul.f32 1.442695, %v1898_v29  ;;  %v2665_v49 = vadd.f32 %v2664_v12, %v2663_v61 }
 0x414   :  { %v2943_v30 = vpop.eup %2942  ;;  %v2415_v8 = vsel %vm1685_vm6, %v2365_v62, 0.0  ;;  %v2067_v33 = vsel %vm1685_vm6, %v2941_v24, 0.0  ;;  %2958 = vlog2.f32 %v2244_v3  ;;  %v2148_v43 = vand.u32 2147483647, %v3703_v58 }
 0x415   :  { %v2439_v35 = vadd.f32 %v2415_v8, %v2414_v32  ;;  %v2316_v36 = vadd.f32 %v2269_v25, %v2116_v50  ;;  %2092 = vst [vmem:[#allocation11 + $0x18] sm:$0xff] %v2067_v33  ;;  %v1970_v38 = vadd.f32 1.0, %v2943_v30  ;;  %2960 = vpow2.f32 %v1930_v22 }
 0x416   :  { %v2945_v37 = vpop.eup %2944  ;;  %v2205_v50 = vmul.f32 1.442695, %v2172_v41  ;;  %v2173_v57 = vsub.f32 0.0, %v2148_v43  ;;  %v3747_v22 = vmul.f32 0.0, %v3674_v9 }
 0x417   :  { %v2947_v44 = vpop.eup %2946  ;;  %v2366_v46 = vsub.f32 %v2316_v36, %v3677_v13  ;;  %v2271_v47 = vmul.f32 0.6931472, %v2945_v37  ;;  %2962 = vrcp.f32 %v1970_v38  ;;  %v2669_v52 = vpop.f32.mrb[76].mxu1  ;;  %v3740_v13 = vadd.f32 %v2665_v49, %v3620_v55 }
 0x418   :  { %v2949_v56 = vpop.eup %2948  ;;  %v2245_v10 = vadd.f32 1.0, %v2947_v44  ;;  %2964 = vpow2.f32 %v1932_v42  ;;  %v2670_v59 = vpop.f32.mrb[77].mxu1  ;;  %v2207_v12 = vmul.f32 1.442695, %v2173_v57  ;;  %v2122_v36 = vmax.f32 %v3699_v53, 0.0 }
 0x419   :  { %v2951_v63 = vpop.eup %2950  ;;  %v2416_v1 = vsel %vm1685_vm6, %v2366_v46, 0.0  ;;  %v2317_v4 = vadd.f32 %v2271_v47, %v2117_v17  ;;  %v1971_v5 = vadd.f32 1.0, %v2949_v56  ;;  %v2672_v6 = vpop.f32.mrb[78].mxu1  ;;  %v1899_v17 = vsub.f32 0.0, %v3740_v13 }
 0x41a   :  { %v2953_v61 = vpop.eup %2952  ;;  %v2440_v48 = vadd.f32 %v2439_v35, %v2416_v1  ;;  %v2068_v11 = vsel %vm1685_vm6, %v2951_v63, 0.0  ;;  %2966 = vlog2.f32 %v2245_v10  ;;  %v2673_v14 = vpop.f32.mrb[79].mxu1  ;;  %v2149_v24 = vand.u32 2147483647, %v3740_v13 }
 0x41b   :  { %v2955_v16 = vpop.eup %2954  ;;  %v2367_v20 = vsub.f32 %v2317_v4, %v3683_v21  ;;  %2093 = vst [vmem:[#allocation11 + $0x20] sm:$0xff] %v2068_v11  ;;  %2968 = vrcp.f32 %v1971_v5  ;;  %v2246_v15 = vadd.f32 1.0, %v2953_v61  ;;  %v1934_v21 = vmul.f32 1.442695, %v1899_v17 }
 0x41c   :  { %v2957_v62 = vpop.eup %2956  ;;  %v2273_v3 = vmul.f32 0.6931472, %v2955_v16  ;;  %2970 = vpow2.f32 %v2205_v50  ;;  %v2174_v8 = vsub.f32 0.0, %v2149_v24  ;;  %v2668_v38 = vadd.f32 %v3717_v23, %v3714_v19 }
 0x41d   :  { %v2417_v25 = vsel %vm1685_vm6, %v2367_v20, 0.0  ;;  %v2069_v28 = vsel %vm1685_vm6, %v2957_v62, 0.0  ;;  %2972 = vlog2.f32 %v2246_v15  ;;  %v2671_v44 = vadd.f32 %v2670_v59, %v2669_v52 }
 0x41e   :  { %v2959_v29 = vpop.eup %2958  ;;  %v2441_v30 = vadd.f32 %v2440_v48, %v2417_v25  ;;  %v2318_v32 = vadd.f32 %v2273_v3, %v2118_v34  ;;  %2094 = vst [vmem:[#allocation11 + $0x28] sm:$0xff] %v2069_v28  ;;  %2974 = vpow2.f32 %v2207_v12  ;;  %v2209_v43 = vmul.f32 1.442695, %v2174_v8 }
 0x41f   :  { %v2961_v33 = vpop.eup %2960  ;;  %v2275_v35 = vmul.f32 0.6931472, %v2959_v29  ;;  %2976 = vpow2.f32 %v1934_v21  ;;  %v2675_v37 = vpop.f32.mrb[80].mxu1  ;;  %v3763_v47 = vadd.f32 %v2668_v38, %v3620_v55  ;;  %v2674_v49 = vadd.f32 %v2673_v14, %v2672_v6 }
 0x420   :  { %v2368_v41 = vsub.f32 %v2318_v32, %v3693_v54  ;;  %v1972_v42 = vadd.f32 1.0, %v2961_v33  ;;  %v2676_v46 = vpop.f32.mrb[81].mxu1  ;;  %v3772_v23 = vadd.f32 %v2671_v44, %v3620_v55  ;;  %v3778_v63 = vmul.f32 0.0, %v3699_v53 }
 0x421   :  { %v2963_v31 = vpop.eup %2962  ;;  %v2319_v34 = vadd.f32 %v2275_v35, %v2119_v60  ;;  %v2677_v56 = vadd.f32 %v2676_v46, %v2675_v37  ;;  %v3765_v10 = vpop.f32.mrb[82].mxu1  ;;  %v2123_v1 = vmax.f32 %v3703_v58, 0.0  ;;  %v1900_v4 = vsub.f32 0.0, %v3763_v47 }
 0x422   :  { %v2965_v50 = vpop.eup %2964  ;;  %v2418_v19 = vsel %vm1685_vm6, %v2368_v41, 0.0  ;;  %v2070_v54 = vsel %vm1685_vm6, %v2963_v31, 0.0  ;;  %2978 = vrcp.f32 %v1972_v42  ;;  %v3774_v40 = vpop.f32.mrb[83].mxu1  ;;  %v2150_v5 = vand.u32 2147483647, %v3763_v47 }
 0x423   :  { %v2442_v60 = vadd.f32 %v2441_v30, %v2418_v19  ;;  %v2369_v52 = vsub.f32 %v2319_v34, %v3711_v2  ;;  %2095 = vst [vmem:[#allocation11 + $0x30] sm:$0xff] %v2070_v54  ;;  %v1973_v57 = vadd.f32 1.0, %v2965_v50  ;;  %2980 = vpow2.f32 %v2209_v43 }
 0x424   :  { %v2967_v59 = vpop.eup %2966  ;;  %v1901_v2 = vsub.f32 0.0, %v3772_v23  ;;  %v1936_v16 = vmul.f32 1.442695, %v1900_v4  ;;  %v2175_v20 = vsub.f32 0.0, %v2150_v5  ;;  %v3791_v3 = vmul.f32 0.0, %v3703_v58 }
 0x425   :  { %v2969_v6 = vpop.eup %2968  ;;  %v2419_v61 = vsel %vm1685_vm6, %v2369_v52, 0.0  ;;  %v2277_v48 = vmul.f32 0.6931472, %v2967_v59  ;;  %2982 = vrcp.f32 %v1973_v57  ;;  %v2124_v24 = vmax.f32 %v3740_v13, 0.0 }
 0x426   :  { %v2971_v11 = vpop.eup %2970  ;;  %v2443_v12 = vadd.f32 %v2442_v60, %v2419_v61  ;;  %v2071_v14 = vsel %vm1685_vm6, %v2969_v6, 0.0  ;;  %2984 = vpow2.f32 %v1936_v16  ;;  %v2211_v29 = vmul.f32 1.442695, %v2175_v20 }
 0x427   :  { %v2973_v15 = vpop.eup %2972  ;;  %v2320_v17 = vadd.f32 %v2277_v48, %v2120_v18  ;;  %2096 = vst [vmem:[#allocation11 + $0x38] sm:$0xff] %v2071_v14  ;;  %v2247_v62 = vadd.f32 1.0, %v2971_v11  ;;  %v2681_v25 = vpop.f32.mrb[84].mxu1  ;;  %v2151_v30 = vand.u32 2147483647, %v3772_v23  ;;  %v3801_v43 = vadd.f32 %v2674_v49, %v3620_v55 }
 0x428   :  { %v2975_v28 = vpop.eup %2974  ;;  %v2279_v21 = vmul.f32 0.6931472, %v2973_v15  ;;  %v1938_v18 = vmul.f32 1.442695, %v1901_v2  ;;  %v2682_v33 = vpop.f32.mrb[85].mxu1  ;;  %v3810_v19 = vmul.f32 0.0, %v3740_v13 }
 0x429   :  { %v2977_v32 = vpop.eup %2976  ;;  %v2370_v8 = vsub.f32 %v2320_v17, %v3720_v27  ;;  %2986 = vlog2.f32 %v2247_v62  ;;  %v2248_v7 = vadd.f32 1.0, %v2975_v28  ;;  %v2176_v37 = vsub.f32 0.0, %v2151_v30  ;;  %v2684_v41 = vpop.f32.mrb[86].mxu1 }
 0x42a   :  { %v2321_v35 = vadd.f32 %v2279_v21, %v2121_v39  ;;  %v1974_v38 = vadd.f32 1.0, %v2977_v32  ;;  %2988 = vpow2.f32 %v2211_v29  ;;  %v3804_v27 = vadd.f32 %v2677_v56, %v3620_v55  ;;  %v2685_v44 = vpop.f32.mrb[87].mxu1 }
 0x42b   :  { %v2420_v42 = vsel %vm1685_vm6, %v2370_v8, 0.0  ;;  %2990 = vlog2.f32 %v2248_v7  ;;  %v2213_v39 = vmul.f32 1.442695, %v2176_v37  ;;  %v1902_v49 = vsub.f32 0.0, %v3801_v43 }
 0x42c   :  { %v2979_v46 = vpop.eup %2978  ;;  %v2444_v31 = vadd.f32 %v2443_v12, %v2420_v42  ;;  %v2371_v9 = vsub.f32 %v2321_v35, %v3747_v22  ;;  %2992 = vrcp.f32 %v1974_v38  ;;  %v2152_v22 = vand.u32 2147483647, %v3801_v43 }
 0x42d   :  { %v2981_v34 = vpop.eup %2980  ;;  %v2072_v50 = vsel %vm1685_vm6, %v2979_v46, 0.0  ;;  %2994 = vpow2.f32 %v1938_v18  ;;  %v2125_v57 = vmax.f32 %v3763_v47, 0.0  ;;  %v1940_v59 = vmul.f32 1.442695, %v1902_v49 }
 0x42e   :  { %v2421_v56 = vsel %vm1685_vm6, %v2371_v9, 0.0  ;;  %2097 = vst [vmem:[#allocation11 + $0x40] sm:$0xff] %v2072_v50  ;;  %v2249_v54 = vadd.f32 1.0, %v2981_v34  ;;  %2996 = vpow2.f32 %v2213_v39  ;;  %v1903_v4 = vsub.f32 0.0, %v3804_v27 }
 0x42f   :  { %v2983_v60 = vpop.eup %2982  ;;  %v3816_v52 = vadd.f32 %v2444_v31, %v2421_v56  ;;  %v2687_v5 = vpop.f32.mrb[88].mxu1  ;;  %v2177_v61 = vsub.f32 0.0, %v2152_v22  ;;  %v2153_v48 = vand.u32 2147483647, %v3804_v27  ;;  %v2680_v12 = vadd.f32 %v3774_v40, %v3765_v10 }
 0x430   :  { %v2073_v6 = vsel %vm1685_vm6, %v2983_v60, 0.0  ;;  %2998 = vlog2.f32 %v2249_v54  ;;  %v2688_v2 = vpop.f32.mrb[89].mxu1  ;;  %v1942_v11 = vmul.f32 1.442695, %v1903_v4  ;;  %v2683_v14 = vadd.f32 %v2682_v33, %v2681_v25  ;;  %v2985_v20 = vpop.eup %2984 }
 0x431   :  { %2098 = vst [vmem:[#allocation11 + $0x48] sm:$0xff] %v2073_v6  ;;  %3000 = vpow2.f32 %v1940_v59  ;;  %v3825_v16 = vpop.f32.mrb[90].mxu1  ;;  %v2215_v15 = vmul.f32 1.442695, %v2177_v61  ;;  %v2178_v17 = vsub.f32 0.0, %v2153_v48  ;;  %v2686_v62 = vadd.f32 %v2685_v44, %v2684_v41 }
 0x432   :  { %v3827_v28 = vadd.f32 %v2688_v2, %v2687_v5  ;;  %v3829_v21 = vpop.f32.mrb[91].mxu1  ;;  %v1975_v30 = vadd.f32 1.0, %v2985_v20  ;;  %3002 = vpow2.f32 %v1942_v11  ;;  %v3832_v32 = vadd.f32 %v2680_v12, %v3620_v55 }
 0x433   :  { %v2987_v29 = vpop.eup %2986  ;;  %v3835_v8 = vadd.f32 %v2683_v14, %v3620_v55  ;;  %v3838_v25 = vmul.f32 0.0, %v3763_v47  ;;  %3004 = vpow2.f32 %v2215_v15  ;;  %v2217_v7 = vmul.f32 1.442695, %v2178_v17 }
 0x434   :  { %v2989_v10 = vpop.eup %2988  ;;  %v2281_v40 = vmul.f32 0.6931472, %v2987_v29  ;;  %3006 = vrcp.f32 %v1975_v30  ;;  %v1904_v35 = vsub.f32 0.0, %v3832_v32  ;;  %v3842_v38 = vadd.f32 %v2686_v62, %v3620_v55 }
 0x435   :  { %v2991_v18 = vpop.eup %2990  ;;  %v2250_v33 = vadd.f32 1.0, %v2989_v10  ;;  %3008 = vpow2.f32 %v2217_v7  ;;  %v2154_v44 = vand.u32 2147483647, %v3832_v32  ;;  %v1905_v39 = vsub.f32 0.0, %v3835_v8 }
 0x436   :  { %v2993_v37 = vpop.eup %2992  ;;  %v2322_v41 = vadd.f32 %v2281_v40, %v2122_v36  ;;  %v2283_v42 = vmul.f32 0.6931472, %v2991_v18  ;;  %v1944_v9 = vmul.f32 1.442695, %v1904_v35  ;;  %v2126_v22 = vmax.f32 %v3772_v23, 0.0 }
 0x437   :  { %v2995_v46 = vpop.eup %2994  ;;  %v2074_v31 = vsel %vm1685_vm6, %v2993_v37, 0.0  ;;  %3010 = vlog2.f32 %v2250_v33  ;;  %v3850_v34 = vpop.f32.mrb[92].mxu1  ;;  %v2179_v56 = vsub.f32 0.0, %v2154_v44  ;;  %v1946_v59 = vmul.f32 1.442695, %v1905_v39 }
 0x438   :  { %v2997_v50 = vpop.eup %2996  ;;  %v2372_v49 = vsub.f32 %v2322_v41, %v3778_v63  ;;  %v2323_v53 = vadd.f32 %v2283_v42, %v2123_v1  ;;  %2099 = vst [vmem:[#allocation11 + $0x50] sm:$0xff] %v2074_v31  ;;  %v1976_v36 = vadd.f32 1.0, %v2995_v46  ;;  %v3855_v54 = vpop.f32.mrb[93].mxu1  ;;  %3012 = vpow2.f32 %v1944_v9 }
 0x439   :  { %v2251_v60 = vadd.f32 1.0, %v2997_v50  ;;  %v3858_v4 = vpop.f32.mrb[94].mxu1  ;;  %v2219_v58 = vmul.f32 1.442695, %v2179_v56  ;;  %v2155_v11 = vand.u32 2147483647, %v3835_v8  ;;  %v2692_v41 = vadd.f32 %v3829_v21, %v3825_v16 }
 0x43a   :  { %v2999_v5 = vpop.eup %2998  ;;  %v2422_v6 = vsel %vm1685_vm6, %v2372_v49, 0.0  ;;  %v2373_v63 = vsub.f32 %v2323_v53, %v3791_v3  ;;  %3014 = vrcp.f32 %v1976_v36  ;;  %v3863_v1 = vpop.f32.mrb[95].mxu1  ;;  %v1906_v20 = vsub.f32 0.0, %v3842_v38 }
 0x43b   :  { %v3001_v61 = vpop.eup %3000  ;;  %v2446_v48 = vadd.f32 %v3816_v52, %v2422_v6  ;;  %v2285_v2 = vmul.f32 0.6931472, %v2999_v5  ;;  %3016 = vlog2.f32 %v2251_v60  ;;  %v2180_v62 = vsub.f32 0.0, %v2155_v11 }
 0x43c   :  { %v2423_v12 = vsel %vm1685_vm6, %v2373_v63, 0.0  ;;  %v1977_v14 = vadd.f32 1.0, %v3001_v61  ;;  %3018 = vpow2.f32 %v2219_v58  ;;  %v3003_v15 = vpop.eup %3002  ;;  %v3874_v52 = vmul.f32 %v3659_v51, %v3772_v23 }
 0x43d   :  { %v2447_v3 = vadd.f32 %v2446_v48, %v2423_v12  ;;  %v2324_v17 = vadd.f32 %v2285_v2, %v2124_v24  ;;  %3020 = vpow2.f32 %v1946_v59  ;;  %v3005_v29 = vpop.eup %3004  ;;  %v1978_v30 = vadd.f32 1.0, %v3003_v15 }
 0x43e   :  { %3022 = vrcp.f32 %v1977_v14  ;;  %v1948_v10 = vmul.f32 1.442695, %v1906_v20  ;;  %v3007_v40 = vpop.eup %3006  ;;  %v2252_v18 = vadd.f32 1.0, %v3005_v29  ;;  %v2221_v33 = vmul.f32 1.442695, %v2180_v62 }
 0x43f   :  { %v2374_v7 = vsub.f32 %v2324_v17, %v3810_v19  ;;  %v2156_v35 = vand.u32 2147483647, %v3842_v38  ;;  %v3878_v37 = vpop.f32.mrb[96].mxu1  ;;  %v3009_v13 = vpop.eup %3008  ;;  %v2075_v24 = vsel %vm1685_vm6, %v3007_v40, 0.0  ;;  %3024 = vrcp.f32 %v1978_v30 }
 0x440   :  { %v3884_v51 = vadd.f32 %v3827_v28, %v3620_v55  ;;  %v2700_v42 = vpop.f32.mrb[97].mxu1  ;;  %2100 = vst [vmem:[#allocation11 + $0x58] sm:$0xff] %v2075_v24  ;;  %3026 = vlog2.f32 %v2252_v18  ;;  %v2253_v46 = vadd.f32 1.0, %v3009_v13  ;;  %v2127_v16 = vmax.f32 %v3801_v43, 0.0 }
 0x441   :  { %v3011_v19 = vpop.eup %3010  ;;  %v2424_v44 = vsel %vm1685_vm6, %v2374_v7, 0.0  ;;  %v2181_v31 = vsub.f32 0.0, %v2156_v35  ;;  %v3890_v9 = vpop.f32.mrb[98].mxu1  ;;  %3028 = vpow2.f32 %v2221_v33  ;;  %v3902_v61 = vadd.f32 %v2692_v41, %v3620_v55 }
 0x442   :  { %v2448_v39 = vadd.f32 %v2447_v3, %v2424_v44  ;;  %v2287_v50 = vmul.f32 0.6931472, %v3011_v19  ;;  %v1907_v28 = vsub.f32 0.0, %v3884_v51  ;;  %v3893_v49 = vpop.f32.mrb[99].mxu1  ;;  %v3013_v53 = vpop.eup %3012  ;;  %3030 = vlog2.f32 %v2253_v46 }
 0x443   :  { %v2223_v21 = vmul.f32 1.442695, %v2181_v31  ;;  %v2157_v36 = vand.u32 2147483647, %v3884_v51  ;;  %v1979_v59 = vadd.f32 1.0, %v3013_v53  ;;  %3032 = vpow2.f32 %v1948_v10 }
 0x444   :  { %v3015_v56 = vpop.eup %3014  ;;  %v2325_v60 = vadd.f32 %v2287_v50, %v2125_v57  ;;  %v1950_v5 = vmul.f32 1.442695, %v1907_v28  ;;  %v2695_v47 = vadd.f32 %v3855_v54, %v3850_v34  ;;  %v1908_v20 = vsub.f32 0.0, %v3902_v61 }
 0x445   :  { %v3017_v6 = vpop.eup %3016  ;;  %v2076_v63 = vsel %vm1685_vm6, %v3015_v56, 0.0  ;;  %3034 = vpow2.f32 %v2223_v21  ;;  %v2182_v58 = vsub.f32 0.0, %v2157_v36  ;;  %v2128_v62 = vmax.f32 %v3804_v27, 0.0 }
 0x446   :  { %v3019_v48 = vpop.eup %3018  ;;  %v2375_v2 = vsub.f32 %v2325_v60, %v3838_v25  ;;  %2101 = vst [vmem:[#allocation11 + $0x60] sm:$0xff] %v2076_v63  ;;  %v2289_v11 = vmul.f32 0.6931472, %v3017_v6  ;;  %3036 = vrcp.f32 %v1979_v59  ;;  %v1952_v10 = vmul.f32 1.442695, %v1908_v20 }
 0x447   :  { %v3021_v57 = vpop.eup %3020  ;;  %v2254_v12 = vadd.f32 1.0, %v3019_v48  ;;  %3038 = vpow2.f32 %v1950_v5  ;;  %v2225_v14 = vmul.f32 1.442695, %v2182_v58  ;;  %v3908_v15 = vpop.f32.mrb[100].mxu1  ;;  %v2158_v23 = vand.u32 2147483647, %v3902_v61 }
 0x448   :  { %v3023_v3 = vpop.eup %3022  ;;  %v2425_v17 = vsel %vm1685_vm6, %v2375_v2, 0.0  ;;  %v2326_v25 = vadd.f32 %v2289_v11, %v2126_v22  ;;  %v1980_v29 = vadd.f32 1.0, %v3021_v57  ;;  %v3915_v30 = vpop.f32.mrb[101].mxu1  ;;  %v3922_v22 = vadd.f32 %v2695_v47, %v3620_v55 }
 0x449   :  { %v2449_v34 = vadd.f32 %v2448_v39, %v2425_v17  ;;  %v2077_v54 = vsel %vm1685_vm6, %v3023_v3, 0.0  ;;  %3040 = vlog2.f32 %v2254_v12  ;;  %v2708_v40 = vpop.f32.mrb[102].mxu1  ;;  %v3025_v7 = vpop.eup %3024  ;;  %v2698_v24 = vadd.f32 %v3863_v1, %v3858_v4 }
 0x44a   :  { %v2376_v18 = vsub.f32 %v2326_v25, %v3874_v52  ;;  %2102 = vst [vmem:[#allocation11 + $0x68] sm:$0xff] %v2077_v54  ;;  %3042 = vrcp.f32 %v1980_v29  ;;  %v2709_v33 = vpop.f32.mrb[103].mxu1  ;;  %v3027_v35 = vpop.eup %3026  ;;  %v2078_v13 = vsel %vm1685_vm6, %v3025_v7, 0.0  ;;  %v2701_v41 = vadd.f32 %v2700_v42, %v3878_v37 }
 0x44b   :  { %3044 = vpow2.f32 %v2225_v14  ;;  %v3029_v19 = vpop.eup %3028  ;;  %v2291_v44 = vmul.f32 0.6931472, %v3027_v35  ;;  %2103 = vst [vmem:[#allocation11 + $0x70] sm:$0xff] %v2078_v13  ;;  %v2183_v46 = vsub.f32 0.0, %v2158_v23  ;;  %v2129_v50 = vmax.f32 %v3832_v32, 0.0 }
 0x44c   :  { %v2426_v52 = vsel %vm1685_vm6, %v2376_v18, 0.0  ;;  %3046 = vpow2.f32 %v1952_v10  ;;  %v3031_v31 = vpop.eup %3030  ;;  %v2255_v28 = vadd.f32 1.0, %v3029_v19  ;;  %v1909_v53 = vsub.f32 0.0, %v3922_v22  ;;  %v3104_v18 = vld [vmem:[%s4060_s8] ss:$0 sm:$0xff]  ;;  %s3281_s8 = smov [#allocation11]  }
 0x44d   :  { %v2450_v39 = vadd.f32 %v2449_v34, %v2426_v52  ;;  %v3033_v21 = vpop.eup %3032  ;;  %v2327_v36 = vadd.f32 %v2291_v44, %v2127_v16  ;;  %v2293_v4 = vmul.f32 0.6931472, %v3031_v31  ;;  %v2227_v1 = vmul.f32 1.442695, %v2183_v46  ;;  %s2479_s25 = sshll.u32 %s3281_s8, 4  ;;  %s2480_s25 = int_to_ptr.vmem [resolvable:$true] %s2479_s25 }
 0x44e   :  { %v2159_v37 = vand.u32 2147483647, %v3922_v22  ;;  %3048 = vlog2.f32 %v2255_v28  ;;  %v1981_v56 = vadd.f32 1.0, %v3033_v21  ;;  %v1954_v60 = vmul.f32 1.442695, %v1909_v53  ;;  %s3215_s26 = scalar_lea.vmem %s2480_s25, 3200  ;;  %p3220_p13 = scmp.lt.s32.totalorder %s2480_s25, %s2480_s25 }
 0x44f   :  { %v3035_v42 = vpop.eup %3034  ;;  %v3935_v59 = vadd.f32 %v2698_v24, %v3620_v55  ;;  %v2377_v6 = vsub.f32 %v2327_v36, %v3801_v43  ;;  %v2328_v63 = vadd.f32 %v2293_v4, %v2128_v62  ;;  %3050 = vpow2.f32 %v2227_v1  ;;  %p3216_p12 = scmp.ne.s32.totalorder %s2480_s25, %s3215_s26  ;;  %p3221_p0 = scmp.lt.s32.totalorder %s3215_s26, %s3215_s26 }
 0x450   :  { %v3037_v5 = vpop.eup %3036  ;;  %v2256_v58 = vadd.f32 1.0, %v3035_v42  ;;  %3052 = vrcp.f32 %v1981_v56  ;;  %v2184_v2 = vsub.f32 0.0, %v2159_v37  ;;  %v2130_v62 = vmax.f32 %v3835_v8, 0.0 }
 0x451   :  { %v3039_v48 = vpop.eup %3038  ;;  %v2079_v16 = vsel %vm1685_vm6, %v3037_v5, 0.0  ;;  %v1910_v11 = vsub.f32 0.0, %v3935_v59  ;;  %v2427_v47 = vsel %vm1685_vm6, %v2377_v6, 0.0  ;;  %v2378_v55 = vsub.f32 %v2328_v63, %v3804_v27  ;;  %p3222_p1 = por %p3221_p0, %p3220_p13 }
 0x452   :  { %2104 = vst [vmem:[#allocation11 + $0x78] sm:$0xff] %v2079_v16  ;;  %3054 = vlog2.f32 %v2256_v58  ;;  %v1982_v57 = vadd.f32 1.0, %v3039_v48  ;;  %v2451_v12 = vadd.f32 %v2450_v39, %v2427_v47  ;;  %v2229_v14 = vmul.f32 1.442695, %v2184_v2 }
 0x453   :  { %v3041_v43 = vpop.eup %3040  ;;  %3056 = vpow2.f32 %v1954_v60  ;;  %v1956_v20 = vmul.f32 1.442695, %v1910_v11  ;;  %v2428_v17 = vsel %vm1685_vm6, %v2378_v55, 0.0  ;;  %v2160_v54 = vand.u32 2147483647, %v3935_v59  ;;  %p3223_p2 = pnand %p3222_p1, %p3216_p12 }
 0x454   :  { %v3043_v3 = vpop.eup %3042  ;;  %v2295_v25 = vmul.f32 0.6931472, %v3041_v43  ;;  %3058 = vrcp.f32 %v1982_v57  ;;  %v2452_v34 = vadd.f32 %v2451_v12, %v2428_v17  ;;  %v3953_v23 = vadd.f32 %v3104_v18, %v2701_v41 }
 0x455   :  { %v3045_v29 = vpop.eup %3044  ;;  %v2080_v27 = vsel %vm1685_vm6, %v3043_v3, 0.0  ;;  %3060 = vpow2.f32 %v2229_v14  ;;  %v2185_v35 = vsub.f32 0.0, %v2160_v54  ;;  %v2704_v13 = vadd.f32 %v3893_v49, %v3890_v9 }
 0x456   :  { %v3047_v10 = vpop.eup %3046  ;;  %v2329_v40 = vadd.f32 %v2295_v25, %v2129_v50  ;;  %2105 = vst [vmem:[#allocation11 + $0x80] sm:$0xff] %v2080_v27  ;;  %v2257_v7 = vadd.f32 1.0, %v3045_v29  ;;  %3062 = vpow2.f32 %v1956_v20  ;;  %v2707_v24 = vadd.f32 %v3915_v30, %v3908_v15 }
 0x457   :  { %v1983_v33 = vadd.f32 1.0, %v3047_v10  ;;  %v2131_v52 = vmax.f32 %v3842_v38, 0.0  ;;  %v1911_v44 = vsub.f32 0.0, %v3953_v23  ;;  %v2231_v31 = vmul.f32 1.442695, %v2185_v35 }
 0x458   :  { %v2379_v19 = vsub.f32 %v2329_v40, %v3832_v32  ;;  %3064 = vlog2.f32 %v2257_v7  ;;  %v3049_v46 = vpop.eup %3048  ;;  %v2161_v41 = vand.u32 2147483647, %v3953_v23  ;;  %v3963_v39 = vadd.f32 %v3104_v18, %v2704_v13 }
 0x459   :  { %3066 = vrcp.f32 %v1983_v33  ;;  %v3051_v50 = vpop.eup %3050  ;;  %v2297_v49 = vmul.f32 0.6931472, %v3049_v46  ;;  %v1958_v15 = vmul.f32 1.442695, %v1911_v44  ;;  %v3967_v30 = vadd.f32 %v3104_v18, %v2707_v24 }
 0x45a   :  { %v2429_v9 = vsel %vm1685_vm6, %v2379_v19, 0.0  ;;  %v3053_v32 = vpop.eup %3052  ;;  %v2258_v53 = vadd.f32 1.0, %v3051_v50  ;;  %3068 = vpow2.f32 %v2231_v31  ;;  %v2186_v21 = vsub.f32 0.0, %v2161_v41 }
 0x45b   :  { %v2453_v28 = vadd.f32 %v2452_v34, %v2429_v9  ;;  %v2330_v4 = vadd.f32 %v2297_v49, %v2130_v62  ;;  %v2081_v1 = vsel %vm1685_vm6, %v3053_v32, 0.0  ;;  %3070 = vpow2.f32 %v1958_v15 }
 0x45c   :  { %v3055_v36 = vpop.eup %3054  ;;  %v1912_v37 = vsub.f32 0.0, %v3963_v39  ;;  %2106 = vst [vmem:[#allocation11 + $0x88] sm:$0xff] %v2081_v1  ;;  %3072 = vlog2.f32 %v2258_v53  ;;  %v2233_v60 = vmul.f32 1.442695, %v2186_v21  ;;  %v2162_v5 = vand.u32 2147483647, %v3963_v39 }
 0x45d   :  { %v3057_v42 = vpop.eup %3056  ;;  %v2299_v56 = vmul.f32 0.6931472, %v3055_v36  ;;  %v2380_v63 = vsub.f32 %v2330_v4, %v3835_v8  ;;  %v1913_v16 = vsub.f32 0.0, %v3967_v30  ;;  %v2163_v62 = vand.u32 2147483647, %v3967_v30 }
 0x45e   :  { %v3059_v6 = vpop.eup %3058  ;;  %v1984_v58 = vadd.f32 1.0, %v3057_v42  ;;  %v1960_v48 = vmul.f32 1.442695, %v1912_v37  ;;  %3074 = vpow2.f32 %v2233_v60  ;;  %v2187_v55 = vsub.f32 0.0, %v2162_v5 }
 0x45f   :  { %v3061_v2 = vpop.eup %3060  ;;  %v2331_v11 = vadd.f32 %v2299_v56, %v2131_v52  ;;  %v2082_v47 = vsel %vm1685_vm6, %v3059_v6, 0.0  ;;  %v2430_v43 = vsel %vm1685_vm6, %v2380_v63, 0.0  ;;  %v1962_v14 = vmul.f32 1.442695, %v1913_v16 }
 0x460   :  { %v3063_v57 = vpop.eup %3062  ;;  %2107 = vst [vmem:[#allocation11 + $0x90] sm:$0xff] %v2082_v47  ;;  %3076 = vrcp.f32 %v1984_v58  ;;  %v2259_v12 = vadd.f32 1.0, %v3061_v2  ;;  %v2454_v8 = vadd.f32 %v2453_v28, %v2430_v43  ;;  %v2235_v25 = vmul.f32 1.442695, %v2187_v55 }
 0x461   :  { %v2381_v20 = vsub.f32 %v2331_v11, %v3842_v38  ;;  %v1985_v3 = vadd.f32 1.0, %v3063_v57  ;;  %3078 = vpow2.f32 %v1960_v48  ;;  %v2132_v27 = vmax.f32 %v3884_v51, 0.0 }
 0x462   :  { %v3065_v17 = vpop.eup %3064  ;;  %3080 = vlog2.f32 %v2259_v12  ;;  %v2188_v38 = vsub.f32 0.0, %v2163_v62  ;;  %v2133_v44 = vmax.f32 %v3902_v61, 0.0  ;;  %v2134_v4 = vmax.f32 %v3922_v22, 0.0 }
 0x463   :  { %v3067_v29 = vpop.eup %3066  ;;  %v2431_v34 = vsel %vm1685_vm6, %v2381_v20, 0.0  ;;  %v2301_v54 = vmul.f32 0.6931472, %v3065_v17  ;;  %3082 = vrcp.f32 %v1985_v3  ;;  %v1711_v16 = vadd.s32 192, %v3491_v45 }
 0x464   :  { %v2455_v10 = vadd.f32 %v2454_v8, %v2431_v34  ;;  %v2083_v40 = vsel %vm1685_vm6, %v3067_v29, 0.0  ;;  %3084 = vpow2.f32 %v2235_v25  ;;  %v3069_v7 = vpop.eup %3068  ;;  %v2237_v13 = vmul.f32 1.442695, %v2188_v38 }
 0x465   :  { %v2332_v18 = vadd.f32 %v2301_v54, %v2132_v27  ;;  %2108 = vst [vmem:[#allocation11 + $0x98] sm:$0xff] %v2083_v40  ;;  %3086 = vpow2.f32 %v1962_v14  ;;  %v3071_v33 = vpop.eup %3070  ;;  %v2260_v35 = vadd.f32 1.0, %v3069_v7  ;;  %v2135_v11 = vmax.f32 %v3935_v59, 0.0 }
 0x466   :  { %v3073_v24 = vpop.eup %3072  ;;  %v1986_v52 = vadd.f32 1.0, %v3071_v33  ;;  %vm1838_vm7 = vcmp.lt.s32.totalorder %v1711_v16, 198  ;;  %v2136_v20 = vmax.f32 %v3953_v23, 0.0  ;;  %v2137_v38 = vmax.f32 %v3963_v39, 0.0 }
 0x467   :  { %v2382_v19 = vsub.f32 %v2332_v18, %v3884_v51  ;;  %v2303_v46 = vmul.f32 0.6931472, %v3073_v24  ;;  %3088 = vlog2.f32 %v2260_v35  ;;  %v2595_v34 = vsel %vm1838_vm7, 1.0, %v3278_v0 }
 0x468   :  { %v3075_v31 = vpop.eup %3074  ;;  %3090 = vrcp.f32 %v1986_v52 }
 0x469   :  { %v2432_v41 = vsel %vm1685_vm6, %v2382_v19, 0.0  ;;  %v2333_v9 = vadd.f32 %v2303_v46, %v2133_v44  ;;  %3092 = vpow2.f32 %v2237_v13  ;;  %v2261_v49 = vadd.f32 1.0, %v3075_v31 }
 0x46a   :  { %v3077_v50 = vpop.eup %3076  ;;  %v2456_v15 = vadd.f32 %v2455_v10, %v2432_v41  ;;  %v2138_v19 = vmax.f32 %v3967_v30, 0.0 }
 0x46b   :  { %v3079_v32 = vpop.eup %3078  ;;  %v2084_v28 = vsel %vm1685_vm6, %v3077_v50, 0.0  ;;  %v2383_v53 = vsub.f32 %v2333_v9, %v3902_v61  ;;  %3094 = vlog2.f32 %v2261_v49 }
 0x46c   :  { %v3081_v51 = vpop.eup %3080  ;;  %2109 = vst [vmem:[#allocation11 + $0xa0] sm:$0xff] %v2084_v28  ;;  %v1987_v21 = vadd.f32 1.0, %v3079_v32 }
 0x46d   :  { %v3083_v36 = vpop.eup %3082  ;;  %v2305_v1 = vmul.f32 0.6931472, %v3081_v51  ;;  %v2433_v56 = vsel %vm1685_vm6, %v2383_v53, 0.0 }
 0x46e   :  { %v3085_v37 = vpop.eup %3084  ;;  %v2085_v42 = vsel %vm1685_vm6, %v3083_v36, 0.0  ;;  %3096 = vrcp.f32 %v1987_v21  ;;  %v2457_v61 = vadd.f32 %v2456_v15, %v2433_v56 }
 0x46f   :  { %v3087_v60 = vpop.eup %3086  ;;  %v2334_v5 = vadd.f32 %v2305_v1, %v2134_v4  ;;  %2110 = vst [vmem:[#allocation11 + $0xa8] sm:$0xff] %v2085_v42  ;;  %v2262_v6 = vadd.f32 1.0, %v3085_v37 }
 0x470   :  { %v1988_v63 = vadd.f32 1.0, %v3087_v60 }
 0x471   :  { %v2384_v58 = vsub.f32 %v2334_v5, %v3922_v22  ;;  %3098 = vlog2.f32 %v2262_v6  ;;  %v3089_v48 = vpop.eup %3088 }
 0x472   :  { %3100 = vrcp.f32 %v1988_v63  ;;  %v3091_v2 = vpop.eup %3090  ;;  %v2307_v47 = vmul.f32 0.6931472, %v3089_v48 }
 0x473   :  { %v2434_v55 = vsel %vm1685_vm6, %v2384_v58, 0.0  ;;  %v3093_v57 = vpop.eup %3092  ;;  %v2086_v43 = vsel %vm1685_vm6, %v3091_v2, 0.0 }
 0x474   :  { %v2458_v12 = vadd.f32 %v2457_v61, %v2434_v55  ;;  %2111 = vst [vmem:[#allocation11 + $0xb0] sm:$0xff] %v2086_v43  ;;  %v2263_v14 = vadd.f32 1.0, %v3093_v57  ;;  %v2335_v22 = vadd.f32 %v2307_v47, %v2135_v11 }
 0x475   :  { %v3095_v8 = vpop.eup %3094 }
 0x476   :  { %v2309_v45 = vmul.f32 0.6931472, %v3095_v8  ;;  %3102 = vlog2.f32 %v2263_v14  ;;  %v2385_v3 = vsub.f32 %v2335_v22, %v3935_v59 }
 0x478   :  { %v3097_v17 = vpop.eup %3096  ;;  %v2336_v62 = vadd.f32 %v2309_v45, %v2136_v20  ;;  %v2435_v29 = vsel %vm1685_vm6, %v2385_v3, 0.0 }
 0x479   :  { %v2087_v25 = vsel %vm1685_vm6, %v3097_v17, 0.0  ;;  %v2459_v27 = vadd.f32 %v2458_v12, %v2435_v29 }
 0x47a   :  { %2112 = vst [vmem:[#allocation11 + $0xb8] sm:$0xff] %v2087_v25  ;;  %v2386_v10 = vsub.f32 %v2336_v62, %v3953_v23 }
 0x47b   :  { %v3099_v54 = vpop.eup %3098 }
 0x47c   :  { %v3101_v40 = vpop.eup %3100  ;;  %v2311_v7 = vmul.f32 0.6931472, %v3099_v54  ;;  %v2436_v18 = vsel %vm1685_vm6, %v2386_v10, 0.0 }
 0x47d   :  { %v2063_v59 = vmul.f32 %v3101_v40, %v2595_v34  ;;  %v2460_v35 = vadd.f32 %v2459_v27, %v2436_v18 }
 0x47e   :  { %v2337_v33 = vadd.f32 %v2311_v7, %v2137_v38 }
 0x47f   :  { %v2088_v13 = vsel %vm1685_vm6, %v2063_v59, 0.0 }
 0x480   :  { %2113 = vst [vmem:[#allocation11 + $0xc0] sm:$0xff] %v2088_v13  ;;  %v2387_v0 = vsub.f32 %v2337_v33, %v3963_v39  ;;  %v3103_v24 = vpop.eup %3102 }
 0x481   :  { %v2313_v23 = vmul.f32 0.6931472, %v3103_v24 }
 0x482   :  { %v2437_v52 = vsel %vm1685_vm6, %v2387_v0, 0.0 }
 0x483   :  { %v2461_v44 = vadd.f32 %v2460_v35, %v2437_v52  ;;  %v2338_v46 = vadd.f32 %v2313_v23, %v2138_v19 }
 0x485   :  { %v2388_v31 = vsub.f32 %v2338_v46, %v3967_v30 }
 0x487   :  { %v2413_v41 = vmul.f32 %v2595_v34, %v2388_v31 }
 0x489   :  { %v2438_v50 = vsel %vm1685_vm6, %v2413_v41, 0.0 }
 0x48a   :  { %v2462_v9 = vadd.f32 %v2461_v44, %v2438_v50 }
 0x48c   :  { %2463 = vadd.xlane.f32.xlu0 %v2462_v9 }
 0x48d   :  { %3226 = shalt.err (!%p3223_p2)
}
 0x48e   :  { %s3227_s30 = scalar_lea.hbm %s4061_s9, 3200 }
 0x48f   :  { %p3228_p3 = scmp.ne.s32.totalorder %s4061_s9, %s3227_s30  ;;  %p3231_p4 = scmp.lt.u32.totalorder %s3227_s30, %s4061_s9 }
 0x491   :  { %p3233_p5 = pnand %p3231_p4, %p3228_p3 }
 0x493   :  { %3236 = shalt.err (!%p3233_p5)
}
 0x494   :  { %2485 = dma.vmem_to_hbm [thread:$0]  %s2480_s25, 3200, %s4061_s9, [#allocation4], %s3274_s14, %s3274_s14, %s3275_s19  }
 0x495   :  { %s3282_s15 = smov [#allocation12]  }
 0x496   :  { %s2492_s17 = sshll.u32 %s3282_s15, 4  ;;  %s2493_s17 = int_to_ptr.vmem [resolvable:$true] %s2492_s17 }
 0x497   :  { %s3237_s3 = scalar_lea.vmem %s2493_s17, 128  ;;  %p3242_p7 = scmp.lt.s32.totalorder %s2493_s17, %s2493_s17 }
 0x498   :  { %p3238_p6 = scmp.ne.s32.totalorder %s2493_s17, %s3237_s3  ;;  %p3243_p8 = scmp.lt.s32.totalorder %s3237_s3, %s3237_s3 }
 0x49a   :  { %p3244_p9 = por %p3243_p8, %p3242_p7 }
 0x49c   :  { %p3245_p10 = pnand %p3244_p9, %p3238_p6 }
 0x519   :  { %v2464_v26 = vpop.xlane.xlu0 %2463 }
 0x51a   :  { %v2465_v39 = vrot.slane %v2464_v26, 4 }
 0x51c   :  { %v2466_v30 = vadd.f32 %v2465_v39, %v2464_v26 }
 0x51e   :  { %v2467_v49 = vrot.slane %v2466_v30, 2 }
 0x520   :  { %v2468_v15 = vadd.f32 %v2467_v49, %v2466_v30 }
 0x522   :  { %v2469_v32 = vrot.slane %v2468_v15, 1 }
 0x524   :  { %v2470_v28 = vadd.f32 %v2469_v32, %v2468_v15 }
 0x526   :  { %2779 = vpush %v2470_v28 }
 0x557   :  { %s2780_s1 = spop %2779 }
 0x558   :  { %v2472_v51 = vstv %s2780_s1 }
 0x559   :  { %2473 = vst [vmem:[#allocation12] sm:$0xff] %v2472_v51 }
 0x55a   :  { %3248 = shalt.err (!%p3245_p10)
}
 0x55b   :  { %s3249_s19 = scalar_lea.hbm %s4062_s10, 128 }
 0x55c   :  { %p3250_p11 = scmp.ne.s32.totalorder %s4062_s10, %s3249_s19  ;;  %p3253_p12 = scmp.lt.u32.totalorder %s3249_s19, %s4062_s10 }
 0x55e   :  { %p3255_p13 = pnand %p3253_p12, %p3250_p11 }
 0x560   :  { %3258 = shalt.err (!%p3255_p13)
}
 0x561   :  { %2495 = dma.vmem_to_hbm [thread:$0]  %s2493_s17, 128, %s4062_s10, [#allocation13]  }
 0x562   :  { %3265 = dma.done.wait [#allocation4], 3200  }
 0x563   :  { %3266 = vsyncadd [#allocation4], 4294964096 }
 0x564   :  { %3267 = dma.done.wait [#allocation13], 128  }
 0x565   :  { %3268 = vsyncadd [#allocation13], 4294967168 }
 0x566   :  { %2502 = vsyncpa [#allocation3], 1 }
 0x567   :  { %2503 = vsyncpa [#allocation6], 1 }
 0x568   :  { %2504 = vsyncpa [#allocation9], 1 }
 0x569   :  { %2505 = vsyncpa [#allocation4], 1 }
 0x56a   :  { %2506 = vsyncpa [#allocation13], 1 }

</bundles_post_ra>
